<compile_context>
chip_gen: v6e
topology: v6e:2x2x1
jax: 0.10.0
libtpu: 0.0.40
codegen_flags: <defaults>
</compile_context>

<pallas_src>
import jax
import jax.numpy as jnp
from jax.experimental import pallas as pl
from jax.experimental.pallas import tpu as pltpu


# ---------------------------------------------------------------------------
# Pallas kernel: fused 4-layer MLP forward (single VMEM-resident block)
# ---------------------------------------------------------------------------
def mlp_kernel(scal_ref,                      # SMEM: [inv_sigma2, inv_sigma3, b4]
               x_ref, w1_ref, bias_ref, w2_hbm, w3_hbm, w4_ref,
               o_ref,
               w2_buf, w3_buf, dma_sem):
    # Kick off the w2/w3 weight DMAs immediately so they overlap the layer-1
    # (K=1024) matmul instead of serializing in front of the whole body.
    cp2 = pltpu.make_async_copy(w2_hbm, w2_buf, dma_sem.at[0])
    cp3 = pltpu.make_async_copy(w3_hbm, w3_buf, dma_sem.at[1])
    cp2.start()
    cp3.start()

    inv_s2 = scal_ref[0]
    inv_s3 = scal_ref[1]
    b4 = scal_ref[2]
    biases = bias_ref[...]                    # [3, Hp] f32 (b1, b2, b3)

    def silu(v):
        return v * jax.nn.sigmoid(v)

    # bf16 x bf16 matmuls on the MXU with f32 accumulation.
    x = x_ref[...].astype(jnp.bfloat16)                                # [B, Dp]
    h = jnp.dot(x, w1_ref[...], preferred_element_type=jnp.float32)    # [B, Hp]
    h = silu(h + biases[0])

    cp2.wait()                                # w2 in VMEM; hidden behind layer 1
    h = jnp.dot(h.astype(jnp.bfloat16), w2_buf[...],
                preferred_element_type=jnp.float32)
    h = silu(h * inv_s2 + biases[1])          # fused spectral-norm 1/sigma

    cp3.wait()                                # w3 in VMEM; hidden behind layers 1-2
    h = jnp.dot(h.astype(jnp.bfloat16), w3_buf[...],
                preferred_element_type=jnp.float32)
    h = silu(h * inv_s3 + biases[2])

    # Final n_out==1 layer: VPU multiply + cross-lane (XLU) reduction instead
    # of a degenerate N=1 MXU matmul.  w4 is a [1, Hp] f32 row.
    # TODO(synk): generalize to n_out > 1 (fall back to an MXU matmul).
    out = jnp.sum(h * w4_ref[...], axis=-1, keepdims=True)             # [B, 1]
    o_ref[...] = out + b4


def mlp_forward(x, params):
    """x: [B, ...] -> flattened to [B, D]. Returns squeeze()'d output."""
    B = x.shape[0]
    x2d = x.reshape(B, -1).astype(jnp.float32)

    scalars, w1, biases, w2, w3, w4 = params
    d_pad, h_pad = w1.shape
    if x2d.shape[1] != d_pad:                      # zero-pad features to Dp
        x2d = jnp.pad(x2d, ((0, 0), (0, d_pad - x2d.shape[1])))
    n_out = 1

    vmem = pl.BlockSpec(memory_space=pltpu.MemorySpace.VMEM)
    smem = pl.BlockSpec(memory_space=pltpu.MemorySpace.SMEM)
    hbm = pl.BlockSpec(memory_space=pl.ANY)        # raw HBM ref; DMA'd manually

    out = pl.pallas_call(
        mlp_kernel,
        out_shape=jax.ShapeDtypeStruct((B, n_out), jnp.float32),
        in_specs=[smem, vmem, vmem, vmem, hbm, hbm, vmem],
        out_specs=vmem,
        scratch_shapes=[
            pltpu.VMEM((h_pad, h_pad), jnp.bfloat16),   # w2 double-use buffer
            pltpu.VMEM((h_pad, h_pad), jnp.bfloat16),   # w3 buffer
            pltpu.SemaphoreType.DMA((2,)),
        ],
    )(scalars, x2d, w1, biases, w2, w3, w4)

    # PyTorch: out.squeeze()  (also squeezes batch when B == 1, as torch does)
    return jnp.squeeze(out)


# ---------------------------------------------------------------------------
# Parameter setup (glue, plain JAX)
# ---------------------------------------------------------------------------
def spectral_sigma(w_out_in, key, n_power_iterations=1, eps=1e-12):
    """sigma estimate as in torch.nn.utils.spectral_norm (one power iteration
    per training-mode forward) for a Linear weight [out, in]."""
    u = jax.random.normal(key, (w_out_in.shape[0],), dtype=jnp.float32)
    u = u / (jnp.linalg.norm(u) + eps)
    v = jnp.zeros((w_out_in.shape[1],), dtype=jnp.float32)
    for _ in range(n_power_iterations):
        v = w_out_in.T @ u
        v = v / (jnp.linalg.norm(v) + eps)
        u = w_out_in @ v
        u = u / (jnp.linalg.norm(u) + eps)
    return u @ (w_out_in @ v)


def _round_up(n, m):
    return ((n + m - 1) // m) * m


def init_mlp_params(key, n_dims, n_out=1, n_hid=300):
    """Matches MLP.initialize_parameters(): weights ~ N(0, 0.01), biases = 0.
    Weights generated as [out, in] (PyTorch convention), sigma computed on the
    raw 300x300 matrices, then transposed to [in, out], zero-padded to lane
    multiples, and cast to bf16 for the big matmuls."""
    assert n_out == 1, "fused final mul+reduce assumes n_out == 1"
    ks = jax.random.split(key, 6)
    w1 = 0.01 * jax.random.normal(ks[0], (n_hid, n_dims), dtype=jnp.float32)
    w2 = 0.01 * jax.random.normal(ks[1], (n_hid, n_hid), dtype=jnp.float32)
    w3 = 0.01 * jax.random.normal(ks[2], (n_hid, n_hid), dtype=jnp.float32)
    w4 = 0.01 * jax.random.normal(ks[3], (n_out, n_hid), dtype=jnp.float32)

    # Spectral-norm scales (fused into the kernel instead of scaling weights).
    inv_s2 = 1.0 / spectral_sigma(w2, ks[4])
    inv_s3 = 1.0 / spectral_sigma(w3, ks[5])
    b4 = jnp.float32(0.0)                          # final-layer bias (init 0)
    scalars = jnp.stack([inv_s2, inv_s3, b4]).astype(jnp.float32)

    d_pad = _round_up(n_dims, 128)      # 1024 -> 1024
    h_pad = _round_up(n_hid, 128)       # 300  -> 384 (do NOT pad to 512)

    def pad2(a, rows, cols):
        return jnp.pad(a, ((0, rows - a.shape[0]), (0, cols - a.shape[1])))

    w1p = pad2(w1.T, d_pad, h_pad).astype(jnp.bfloat16)   # [Dp, Hp]
    w2p = pad2(w2.T, h_pad, h_pad).astype(jnp.bfloat16)   # [Hp, Hp]
    w3p = pad2(w3.T, h_pad, h_pad).astype(jnp.bfloat16)   # [Hp, Hp]
    w4p = pad2(w4, n_out, h_pad).astype(jnp.float32)      # [1,  Hp] row

    # b1/b2/b3 stacked into one [3, Hp] array (all zero per torch init; padded
    # channels stay zero so SiLU(0) = 0 keeps the math exact).
    biases = jnp.zeros((3, h_pad), dtype=jnp.float32)

    return (scalars, w1p, biases, w2p, w3p, w4p)


# ---------------------------------------------------------------------------
# Pure-JAX reference (mirrors the kernel's bf16/f32-accum math)
# ---------------------------------------------------------------------------
def mlp_reference(x, params):
    scalars, w1, biases, w2, w3, w4 = params
    B = x.shape[0]
    h = x.reshape(B, -1).astype(jnp.float32)
    d_pad = w1.shape[0]
    h = jnp.pad(h, ((0, 0), (0, d_pad - h.shape[1])))

    def dot(a, w):
        return jnp.dot(a.astype(jnp.bfloat16), w,
                       preferred_element_type=jnp.float32)

    h = jax.nn.silu(dot(h, w1) + biases[0])
    h = jax.nn.silu(dot(h, w2) * scalars[0] + biases[1])
    h = jax.nn.silu(dot(h, w3) * scalars[1] + biases[2])
    out = jnp.sum(h * w4, axis=-1, keepdims=True) + scalars[2]
    return jnp.squeeze(out)


if __name__ == "__main__":
    key = jax.random.PRNGKey(0)
    k_x, k_p = jax.random.split(key)

    # Input consistent with the module's view(x.size(0), -1):
    # NCHW [2, 4, 16, 16] -> flattened to [2, 1024].
    B, C, H, W = 2, 4, 16, 16
    n_dims = C * H * W

    x = jax.random.normal(k_x, (B, C, H, W), dtype=jnp.float32)
    params = init_mlp_params(k_p, n_dims, n_out=1, n_hid=300)

    out = jax.block_until_ready(mlp_forward(x, params))
    ref = mlp_reference(x, params)

    assert out.shape == ref.shape == (B,), (out.shape, ref.shape)
    assert jnp.allclose(out, ref, atol=1e-4, rtol=1e-3), (out, ref)

    print("KERNEL_OK")
</pallas_src>

<mosaic_0001>
module attributes {stable_mosaic.version = 11 : i64} {
  func.func @mlp_kernel(%arg0: memref<3xf32, #tpu.memory_space<smem>>, %arg1: memref<2x1024xf32, #tpu.memory_space<vmem>>, %arg2: memref<1024x384xbf16, #tpu.memory_space<vmem>>, %arg3: memref<3x384xf32, #tpu.memory_space<vmem>>, %arg4: memref<384x384xbf16, #tpu.memory_space<any>>, %arg5: memref<384x384xbf16, #tpu.memory_space<any>>, %arg6: memref<1x384xf32, #tpu.memory_space<vmem>>, %arg7: memref<2x1xf32, #tpu.memory_space<vmem>>, %arg8: memref<384x384xbf16, #tpu.memory_space<vmem>>, %arg9: memref<384x384xbf16, #tpu.memory_space<vmem>>, %arg10: memref<2x!tpu.dma_semaphore, #tpu.memory_space<semaphore_mem>>) attributes {dimension_semantics = [], scalar_prefetch = 0 : i64, scratch_operands = 3 : i64, tpu.core_type = #tpu.core_type<tc>} {
    %c0_i32 = arith.constant 0 : i32
    %0 = tpu.memref_slice %arg10[%c0_i32] : memref<2x!tpu.dma_semaphore, #tpu.memory_space<semaphore_mem>> -> memref<1x!tpu.dma_semaphore, #tpu.memory_space<semaphore_mem>>
    %1 = tpu.memref_squeeze %0 : memref<1x!tpu.dma_semaphore, #tpu.memory_space<semaphore_mem>> -> memref<!tpu.dma_semaphore, #tpu.memory_space<semaphore_mem>>
    tpu.enqueue_dma source(%arg4 : memref<384x384xbf16, #tpu.memory_space<any>>) target(%arg8 : memref<384x384xbf16, #tpu.memory_space<vmem>>) target_semaphore(%1 : memref<!tpu.dma_semaphore, #tpu.memory_space<semaphore_mem>>)
    %c1_i32 = arith.constant 1 : i32
    %2 = tpu.memref_slice %arg10[%c1_i32] : memref<2x!tpu.dma_semaphore, #tpu.memory_space<semaphore_mem>> -> memref<1x!tpu.dma_semaphore, #tpu.memory_space<semaphore_mem>>
    %3 = tpu.memref_squeeze %2 : memref<1x!tpu.dma_semaphore, #tpu.memory_space<semaphore_mem>> -> memref<!tpu.dma_semaphore, #tpu.memory_space<semaphore_mem>>
    tpu.enqueue_dma source(%arg5 : memref<384x384xbf16, #tpu.memory_space<any>>) target(%arg9 : memref<384x384xbf16, #tpu.memory_space<vmem>>) target_semaphore(%3 : memref<!tpu.dma_semaphore, #tpu.memory_space<semaphore_mem>>)
    %c0 = arith.constant 0 : index
    %4 = memref.load %arg0[%c0] : memref<3xf32, #tpu.memory_space<smem>>
    %c1 = arith.constant 1 : index
    %5 = memref.load %arg0[%c1] : memref<3xf32, #tpu.memory_space<smem>>
    %c2 = arith.constant 2 : index
    %6 = memref.load %arg0[%c2] : memref<3xf32, #tpu.memory_space<smem>>
    %c0_0 = arith.constant 0 : index
    %c0_1 = arith.constant 0 : index
    %7 = vector.load %arg3[%c0_0, %c0_1] : memref<3x384xf32, #tpu.memory_space<vmem>>, vector<3x384xf32>
    %c0_2 = arith.constant 0 : index
    %c0_3 = arith.constant 0 : index
    %8 = vector.load %arg1[%c0_2, %c0_3] : memref<2x1024xf32, #tpu.memory_space<vmem>>, vector<2x1024xf32>
    %9 = arith.truncf %8 : vector<2x1024xf32> to vector<2x1024xbf16>
    %c0_4 = arith.constant 0 : index
    %c0_5 = arith.constant 0 : index
    %10 = vector.load %arg2[%c0_4, %c0_5] : memref<1024x384xbf16, #tpu.memory_space<vmem>>, vector<1024x384xbf16>
    %cst = arith.constant dense<0.000000e+00> : vector<2x384xf32>
    %11 = tpu.matmul %9, %10, %cst {dimension_numbers = #tpu.dot_dimension_numbers<[1], [0], [0], [1], [0, 0, 1, 1], [], []>} : vector<2x1024xbf16>, vector<1024x384xbf16>, vector<2x384xf32> -> vector<2x384xf32>
    %12 = vector.extract_strided_slice %7 {offsets = [0, 0], sizes = [1, 384], strides = [1, 1]} : vector<3x384xf32> to vector<1x384xf32>
    %13 = vector.shape_cast %12 : vector<1x384xf32> to vector<384xf32>
    %14 = vector.shape_cast %13 : vector<384xf32> to vector<1x384xf32>
    %15 = vector.broadcast %14 : vector<1x384xf32> to vector<2x384xf32>
    %16 = arith.addf %11, %15 : vector<2x384xf32>
    %17 = arith.negf %16 : vector<2x384xf32>
    %18 = math.exp %17 : vector<2x384xf32>
    %cst_6 = arith.constant 1.000000e+00 : f32
    %19 = vector.broadcast %cst_6 : f32 to vector<2x384xf32>
    %20 = arith.addf %19, %18 : vector<2x384xf32>
    %21 = arith.divf %19, %20 : vector<2x384xf32>
    %22 = arith.mulf %16, %21 : vector<2x384xf32>
    %c0_i32_7 = arith.constant 0 : i32
    %23 = tpu.memref_slice %arg10[%c0_i32_7] : memref<2x!tpu.dma_semaphore, #tpu.memory_space<semaphore_mem>> -> memref<1x!tpu.dma_semaphore, #tpu.memory_space<semaphore_mem>>
    %24 = tpu.memref_squeeze %23 : memref<1x!tpu.dma_semaphore, #tpu.memory_space<semaphore_mem>> -> memref<!tpu.dma_semaphore, #tpu.memory_space<semaphore_mem>>
    tpu.wait_dma2 semaphore(%24 : memref<!tpu.dma_semaphore, #tpu.memory_space<semaphore_mem>>) src(%arg4 : memref<384x384xbf16, #tpu.memory_space<any>>) dst(%arg8 : memref<384x384xbf16, #tpu.memory_space<vmem>>)
    %25 = arith.truncf %22 : vector<2x384xf32> to vector<2x384xbf16>
    %c0_8 = arith.constant 0 : index
    %c0_9 = arith.constant 0 : index
    %26 = vector.load %arg8[%c0_8, %c0_9] : memref<384x384xbf16, #tpu.memory_space<vmem>>, vector<384x384xbf16>
    %cst_10 = arith.constant dense<0.000000e+00> : vector<2x384xf32>
    %27 = tpu.matmul %25, %26, %cst_10 {dimension_numbers = #tpu.dot_dimension_numbers<[1], [0], [0], [1], [0, 0, 1, 1], [], []>} : vector<2x384xbf16>, vector<384x384xbf16>, vector<2x384xf32> -> vector<2x384xf32>
    %28 = vector.broadcast %4 : f32 to vector<2x384xf32>
    %29 = arith.mulf %27, %28 : vector<2x384xf32>
    %30 = vector.extract_strided_slice %7 {offsets = [1, 0], sizes = [1, 384], strides = [1, 1]} : vector<3x384xf32> to vector<1x384xf32>
    %31 = vector.shape_cast %30 : vector<1x384xf32> to vector<384xf32>
    %32 = vector.shape_cast %31 : vector<384xf32> to vector<1x384xf32>
    %33 = vector.broadcast %32 : vector<1x384xf32> to vector<2x384xf32>
    %34 = arith.addf %29, %33 : vector<2x384xf32>
    %35 = arith.negf %34 : vector<2x384xf32>
    %36 = math.exp %35 : vector<2x384xf32>
    %cst_11 = arith.constant 1.000000e+00 : f32
    %37 = vector.broadcast %cst_11 : f32 to vector<2x384xf32>
    %38 = arith.addf %37, %36 : vector<2x384xf32>
    %39 = arith.divf %37, %38 : vector<2x384xf32>
    %40 = arith.mulf %34, %39 : vector<2x384xf32>
    %c1_i32_12 = arith.constant 1 : i32
    %41 = tpu.memref_slice %arg10[%c1_i32_12] : memref<2x!tpu.dma_semaphore, #tpu.memory_space<semaphore_mem>> -> memref<1x!tpu.dma_semaphore, #tpu.memory_space<semaphore_mem>>
    %42 = tpu.memref_squeeze %41 : memref<1x!tpu.dma_semaphore, #tpu.memory_space<semaphore_mem>> -> memref<!tpu.dma_semaphore, #tpu.memory_space<semaphore_mem>>
    tpu.wait_dma2 semaphore(%42 : memref<!tpu.dma_semaphore, #tpu.memory_space<semaphore_mem>>) src(%arg5 : memref<384x384xbf16, #tpu.memory_space<any>>) dst(%arg9 : memref<384x384xbf16, #tpu.memory_space<vmem>>)
    %43 = arith.truncf %40 : vector<2x384xf32> to vector<2x384xbf16>
    %c0_13 = arith.constant 0 : index
    %c0_14 = arith.constant 0 : index
    %44 = vector.load %arg9[%c0_13, %c0_14] : memref<384x384xbf16, #tpu.memory_space<vmem>>, vector<384x384xbf16>
    %cst_15 = arith.constant dense<0.000000e+00> : vector<2x384xf32>
    %45 = tpu.matmul %43, %44, %cst_15 {dimension_numbers = #tpu.dot_dimension_numbers<[1], [0], [0], [1], [0, 0, 1, 1], [], []>} : vector<2x384xbf16>, vector<384x384xbf16>, vector<2x384xf32> -> vector<2x384xf32>
    %46 = vector.broadcast %5 : f32 to vector<2x384xf32>
    %47 = arith.mulf %45, %46 : vector<2x384xf32>
    %48 = vector.extract_strided_slice %7 {offsets = [2, 0], sizes = [1, 384], strides = [1, 1]} : vector<3x384xf32> to vector<1x384xf32>
    %49 = vector.shape_cast %48 : vector<1x384xf32> to vector<384xf32>
    %50 = vector.shape_cast %49 : vector<384xf32> to vector<1x384xf32>
    %51 = vector.broadcast %50 : vector<1x384xf32> to vector<2x384xf32>
    %52 = arith.addf %47, %51 : vector<2x384xf32>
    %53 = arith.negf %52 : vector<2x384xf32>
    %54 = math.exp %53 : vector<2x384xf32>
    %cst_16 = arith.constant 1.000000e+00 : f32
    %55 = vector.broadcast %cst_16 : f32 to vector<2x384xf32>
    %56 = arith.addf %55, %54 : vector<2x384xf32>
    %57 = arith.divf %55, %56 : vector<2x384xf32>
    %58 = arith.mulf %52, %57 : vector<2x384xf32>
    %c0_17 = arith.constant 0 : index
    %c0_18 = arith.constant 0 : index
    %59 = vector.load %arg6[%c0_17, %c0_18] : memref<1x384xf32, #tpu.memory_space<vmem>>, vector<1x384xf32>
    %60 = vector.broadcast %59 : vector<1x384xf32> to vector<2x384xf32>
    %61 = arith.mulf %58, %60 : vector<2x384xf32>
    %cst_19 = arith.constant dense<0.000000e+00> : vector<2xf32>
    %62 = vector.multi_reduction <add>, %61, %cst_19 [1] : vector<2x384xf32> to vector<2xf32>
    %63 = vector.shape_cast %62 : vector<2xf32> to vector<2x1xf32>
    %64 = vector.broadcast %6 : f32 to vector<2x1xf32>
    %65 = arith.addf %63, %64 : vector<2x1xf32>
    %c0_20 = arith.constant 0 : index
    %c0_21 = arith.constant 0 : index
    %66 = vector.load %arg7[%c0_20, %c0_21] : memref<2x1xf32, #tpu.memory_space<vmem>>, vector<2x1xf32>
    tpu.vector_store %arg7[%c0_20, %c0_21], %65 {strides = array<i32>} : memref<2x1xf32, #tpu.memory_space<vmem>>, vector<2x1xf32>,
    return
  }
}

</mosaic_0001>

<bundles_post_ra>
// kernel: tpu_custom_call.1
= control target key start
LH: loop header
LB: loop body
LE: loop exit
PB: predicated region body
PF: predicated region fallthrough
CT: control target
= control target key end

     0   :  { %12 = vsyncpa [#allocation7], 0  ;;  %s4647_s0 = inlined_call_operand.hbm [shape: f32[3], index: 0, kind: input, shape index: {}]   ;;  %s4648_s1 = inlined_call_operand.hbm [shape: f32[2,1024], index: 1, kind: input, shape index: {}]   ;;  %s4649_s2 = inlined_call_operand.hbm [shape: bf16[1024,384], index: 2, kind: input, shape index: {}]   ;;  %s4650_s3 = inlined_call_operand.hbm [shape: f32[3,384], index: 3, kind: input, shape index: {}]   ;;  %s4651_s4 = inlined_call_operand.hbm [shape: bf16[384,384], index: 4, kind: input, shape index: {}]   ;;  %s4652_s5 = inlined_call_operand.hbm [shape: bf16[384,384], index: 5, kind: input, shape index: {}]   ;;  %s4653_s6 = inlined_call_operand.vmem [shape: f32[1,384], index: 6, kind: input, shape index: {}]   ;;  %s4654_s7 = inlined_call_operand.vmem [shape: f32[2,1], index: 7, kind: output, shape index: {}]  }
   0x1   :  { %13 = vsyncpa [#allocation6], 0 }
   0x2   :  { %14 = vsyncpa [#allocation10], 0  ;;  %s4420_s24 = smov [#allocation9]  }
   0x3   :  { %s38_s25 = sshll.u32 %s4420_s24, 4  ;;  %s39_s25 = int_to_ptr.vmem [resolvable:$true] %s38_s25 }
   0x4   :  { %s4310_s26 = scalar_lea.vmem %s39_s25, 24576  ;;  %p4315_p1 = scmp.lt.s32.totalorder %s39_s25, %s39_s25 }
   0x5   :  { %p4311_p0 = scmp.ne.s32.totalorder %s39_s25, %s4310_s26  ;;  %p4316_p2 = scmp.lt.s32.totalorder %s4310_s26, %s4310_s26 }
   0x7   :  { %p4317_p3 = por %p4316_p2, %p4315_p1 }
   0x9   :  { %p4318_p4 = pnand %p4317_p3, %p4311_p0 }
   0xb   :  { %4321 = shalt.err (!%p4318_p4)
}
   0xc   :  { %s4421_s27 = smov 192   ;;  %s4422_s28 = smov 12  }
   0xd   :  { %44 = dma.hbm_to_vmem [thread:$0]  %s4649_s2, 24576, %s39_s25, [#allocation10], %s4421_s27, %s4421_s27, %s4422_s28  }
   0xe   :  { %s4423_s8 = smov [#allocation5]   ;;  %s4424_s11 = smov [#allocation8]  }
   0xf   :  { %22 = dma.hbm_to_smem %s4647_s0, 16, %s4423_s8, [#allocation7]  }
  0x10   :  { %s29_s12 = sshll.u32 %s4424_s11, 4  ;;  %s4425_s13 = smov [#allocation11]   ;;  %s30_s12 = int_to_ptr.vmem [resolvable:$true] %s29_s12 }
  0x11   :  { %s51_s14 = sshll.u32 %s4425_s13, 4  ;;  %s4338_s15 = scalar_lea.vmem %s30_s12, 256  ;;  %s52_s14 = int_to_ptr.vmem [resolvable:$true] %s51_s14 }
  0x12   :  { %p4339_p5 = scmp.ne.s32.totalorder %s30_s12, %s4338_s15  ;;  %p4343_p6 = scmp.lt.s32.totalorder %s30_s12, %s30_s12 }
  0x13   :  { %p4344_p7 = scmp.lt.s32.totalorder %s4338_s15, %s4338_s15 }
  0x15   :  { %p4345_p8 = por %p4344_p7, %p4343_p6 }
  0x17   :  { %p4346_p9 = pnand %p4345_p8, %p4339_p5 }
  0x19   :  { %4349 = shalt.err (!%p4346_p9)
}
  0x1a   :  { %32 = dma.hbm_to_vmem [thread:$0]  %s4648_s1, 256, %s30_s12, [#allocation6]  }
  0x1b   :  { %s4358_s17 = scalar_lea.vmem %s52_s14, 192  ;;  %p4363_p11 = scmp.lt.s32.totalorder %s52_s14, %s52_s14 }
  0x1c   :  { %p4359_p10 = scmp.ne.s32.totalorder %s52_s14, %s4358_s17  ;;  %p4364_p12 = scmp.lt.s32.totalorder %s4358_s17, %s4358_s17 }
  0x1e   :  { %p4365_p13 = por %p4364_p12, %p4363_p11 }
  0x20   :  { %p4366_p0 = pnand %p4365_p13, %p4359_p10 }
  0x22   :  { %4369 = shalt.err (!%p4366_p0)
}
  0x23   :  { %54 = dma.hbm_to_vmem [thread:$0]  %s4650_s3, 192, %s52_s14, [#allocation10]  }
  0x24   :  { %4410 = dma.done.wait [#allocation7], 16  }
  0x25   :  { %4411 = vsyncadd [#allocation7], 4294967280 }
  0x26   :  { %4412 = dma.done.wait [#allocation6], 256  }
  0x27   :  { %4413 = vsyncadd [#allocation6], 4294967040 }
  0x28   :  { %4414 = dma.done.wait [#allocation10], 24768  }
  0x29   :  { %4415 = vsyncadd [#allocation10], 4294942528 }
  0x2a   :  { %69 = sfence }
  0x2b   :  { %s4484_s19 = sld [smem:[#allocation5]]  ;;  %v3816_v0 = vld [vmem:[#allocation9 + $0xac] ss:$12 sps:$4 sm:$0xff]   ;;  %v3820_v2 = vld [vmem:[#allocation9 + $0xa8] ss:$12 sps:$4 sm:$0xff]   ;;  %v107_v39 = vlaneseq  ;;  %s4427_s3 = smov [#allocation2]  }
  0x2c   :  { %s4486_s1 = sld [smem:[#allocation5 + $0x1]]  ;;  %v3818_v1 = vld [vmem:[#allocation9 + $0x22c] ss:$12 sps:$4 sm:$0xff]   ;;  %1462 = vmatprep.subr.bf16.mxu0 %v3816_v0  ;;  %v3821_v3 = vld [vmem:[#allocation9 + $0x228] ss:$12 sps:$4 sm:$0xff]   ;;  %s78_s21 = sshll.u32 %s4427_s3, 4  ;;  %s79_s21 = int_to_ptr.vmem [resolvable:$true] %s78_s21 }
  0x2d   :  { %s4488_s20 = sld [smem:[#allocation5 + $0x2]]  ;;  %1503 = vmatprep.subr.bf16.mxu1 %v3818_v1  ;;  %v3822_v4 = vld [vmem:[#allocation9 + $0x94] ss:$12 sps:$4 sm:$0xff]   ;;  %1463 = vmatpush1.bf16.msra.mxu0 %v3820_v2  ;;  %v3826_v6 = vld [vmem:[#allocation9 + $0x90] ss:$12 sps:$4 sm:$0xff]   ;;  %v4490_v44 = vshrl.u32 %v107_v39, 7  ;;  %p4383_p2 = scmp.lt.s32.totalorder %s79_s21, %s79_s21 }
  0x2e   :  { %1504 = vmatpush1.bf16.msra.mxu1 %v3821_v3  ;;  %v3824_v5 = vld [vmem:[#allocation9 + $0x214] ss:$12 sps:$4 sm:$0xff]   ;;  %1464 = vmatprep.subr.bf16.mxu0 %v3822_v4  ;;  %v3827_v7 = vld [vmem:[#allocation9 + $0x210] ss:$12 sps:$4 sm:$0xff]   ;;  %v3832_v10 = vld [vmem:[#allocation9 + $0x78] ss:$12 sps:$4 sm:$0xff]  }
  0x2f   :  { %1505 = vmatprep.subr.bf16.mxu1 %v3824_v5  ;;  %v3828_v8 = vld [vmem:[#allocation9 + $0x7c] ss:$12 sps:$4 sm:$0xff]   ;;  %v3833_v11 = vld [vmem:[#allocation9 + $0x1f8] ss:$12 sps:$4 sm:$0xff]   ;;  %v3838_v14 = vld [vmem:[#allocation9 + $0x60] ss:$12 sps:$4 sm:$0xff]  }
  0x30   :  { %v3830_v9 = vld [vmem:[#allocation9 + $0x1fc] ss:$12 sps:$4 sm:$0xff]   ;;  %v3834_v12 = vld [vmem:[#allocation9 + $0x64] ss:$12 sps:$4 sm:$0xff]   ;;  %v3839_v15 = vld [vmem:[#allocation9 + $0x1e0] ss:$12 sps:$4 sm:$0xff]  }
  0x31   :  { %1465 = vmatpush1.bf16.msra.mxu0 %v3826_v6  ;;  %v3836_v13 = vld [vmem:[#allocation9 + $0x1e4] ss:$12 sps:$4 sm:$0xff]   ;;  %v3840_v16 = vld [vmem:[#allocation9 + $0x4c] ss:$12 sps:$4 sm:$0xff]   ;;  %v3844_v18 = vld [vmem:[#allocation9 + $0x48] ss:$12 sps:$4 sm:$0xff]  }
  0x32   :  { %1506 = vmatpush1.bf16.msra.mxu1 %v3827_v7  ;;  %1466 = vmatprep.subr.bf16.mxu0 %v3828_v8  ;;  %v3842_v17 = vld [vmem:[#allocation9 + $0x1cc] ss:$12 sps:$4 sm:$0xff]   ;;  %v3845_v19 = vld [vmem:[#allocation9 + $0x1c8] ss:$12 sps:$4 sm:$0xff]   ;;  %v3850_v22 = vld [vmem:[#allocation9 + $0x30] ss:$12 sps:$4 sm:$0xff]  }
  0x33   :  { %1507 = vmatprep.subr.bf16.mxu1 %v3830_v9  ;;  %v3846_v20 = vld [vmem:[#allocation9 + $0x34] ss:$12 sps:$4 sm:$0xff]   ;;  %v3851_v23 = vld [vmem:[#allocation9 + $0x1b0] ss:$12 sps:$4 sm:$0xff]   ;;  %v3856_v26 = vld [vmem:[#allocation9 + $0x18] ss:$12 sps:$4 sm:$0xff]  }
  0x34   :  { %v3848_v21 = vld [vmem:[#allocation9 + $0x1b4] ss:$12 sps:$4 sm:$0xff]   ;;  %v3852_v24 = vld [vmem:[#allocation9 + $0x1c] ss:$12 sps:$4 sm:$0xff]   ;;  %v3857_v27 = vld [vmem:[#allocation9 + $0x198] ss:$12 sps:$4 sm:$0xff]  }
  0x35   :  { %1467 = vmatpush1.bf16.msra.mxu0 %v3832_v10  ;;  %v3854_v25 = vld [vmem:[#allocation9 + $0x19c] ss:$12 sps:$4 sm:$0xff]   ;;  %v3858_v28 = vld [vmem:[#allocation9 + $0x4] ss:$12 sps:$4 sm:$0xff]   ;;  %v3862_v30 = vld [vmem:[#allocation9] ss:$12 sps:$4 sm:$0xff]  }
  0x36   :  { %1508 = vmatpush1.bf16.msra.mxu1 %v3833_v11  ;;  %1468 = vmatprep.subr.bf16.mxu0 %v3834_v12  ;;  %v3860_v29 = vld [vmem:[#allocation9 + $0x184] ss:$12 sps:$4 sm:$0xff]   ;;  %v3863_v31 = vld [vmem:[#allocation9 + $0x180] ss:$12 sps:$4 sm:$0xff]   ;;  %v3868_v34 = vld [vmem:[#allocation9 + $0x168] ss:$12 sps:$4 sm:$0xff]  }
  0x37   :  { %1509 = vmatprep.subr.bf16.mxu1 %v3836_v13  ;;  %v3864_v32 = vld [vmem:[#allocation9 + $0x16c] ss:$12 sps:$4 sm:$0xff]   ;;  %v3869_v35 = vld [vmem:[#allocation9 + $0x2e8] ss:$12 sps:$4 sm:$0xff]   ;;  %v4426_v37 = vmov 1983009808  }
  0x38   :  { %v3866_v33 = vld [vmem:[#allocation9 + $0x2ec] ss:$12 sps:$4 sm:$0xff]   ;;  %v3870_v36 = vld [vmem:[#allocation9 + $0x154] ss:$12 sps:$4 sm:$0xff]   ;;  %v105_v38 = vunpack.c.l.s4 %v4426_v37  ;;  %v3874_v41 = vld [vmem:[#allocation9 + $0x150] ss:$12 sps:$4 sm:$0xff]  }
  0x39   :  { %1469 = vmatpush1.bf16.msra.mxu0 %v3838_v14  ;;  %v3872_v40 = vld [vmem:[#allocation9 + $0x2d4] ss:$12 sps:$4 sm:$0xff]   ;;  %v3875_v42 = vld [vmem:[#allocation9 + $0x2d0] ss:$12 sps:$4 sm:$0xff]   ;;  %v3880_v47 = vld [vmem:[#allocation9 + $0x138] ss:$12 sps:$4 sm:$0xff]  }
  0x3a   :  { %1510 = vmatpush1.bf16.msra.mxu1 %v3839_v15  ;;  %1470 = vmatprep.subr.bf16.mxu0 %v3840_v16  ;;  %v106_v43 = vunpack.c.0.s8 %v105_v38  ;;  %v3876_v45 = vld [vmem:[#allocation9 + $0x13c] ss:$12 sps:$4 sm:$0xff]   ;;  %v3881_v48 = vld [vmem:[#allocation9 + $0x2b8] ss:$12 sps:$4 sm:$0xff]   ;;  %v99_v52 = vld [vmem:[#allocation8] sm:$0xff]  ;;  %s4428_s22 = smov [#allocation3]  }
  0x3b   :  { %1511 = vmatprep.subr.bf16.mxu1 %v3842_v17  ;;  %v3878_v46 = vld [vmem:[#allocation9 + $0x2bc] ss:$12 sps:$4 sm:$0xff]   ;;  %v3882_v49 = vld [vmem:[#allocation9 + $0x124] ss:$12 sps:$4 sm:$0xff]   ;;  %v3886_v53 = vld [vmem:[#allocation9 + $0x120] ss:$12 sps:$4 sm:$0xff]   ;;  %v103_v56 = vcombine.high %v99_v52, %v99_v52 }
  0x3c   :  { %v4493_v50 = vsub.s32 %v106_v43, %v4490_v44  ;;  %v3884_v51 = vld [vmem:[#allocation9 + $0x2a4] ss:$12 sps:$4 sm:$0xff]   ;;  %v3887_v54 = vld [vmem:[#allocation9 + $0x2a0] ss:$12 sps:$4 sm:$0xff]   ;;  %v3892_v61 = vld [vmem:[#allocation9 + $0x108] ss:$12 sps:$4 sm:$0xff]  }
  0x3d   :  { %1471 = vmatpush1.bf16.msra.mxu0 %v3844_v18  ;;  %v3888_v57 = vld [vmem:[#allocation9 + $0x10c] ss:$12 sps:$4 sm:$0xff]   ;;  %v3893_v62 = vld [vmem:[#allocation9 + $0x288] ss:$12 sps:$4 sm:$0xff]   ;;  %v3898_v4 = vld [vmem:[#allocation9 + $0xf0] ss:$12 sps:$4 sm:$0xff]  }
  0x3e   :  { %1512 = vmatpush1.bf16.msra.mxu1 %v3845_v19  ;;  %1472 = vmatprep.subr.bf16.mxu0 %v3846_v20  ;;  %v110_v55 = vrot.slane %v99_v52, %v4493_v50  ;;  %v3890_v58 = vld [vmem:[#allocation9 + $0x28c] ss:$12 sps:$4 sm:$0xff]   ;;  %v117_v60 = vrot.slane %v103_v56, %v4493_v50  ;;  %v3894_v1 = vld [vmem:[#allocation9 + $0xf4] ss:$12 sps:$4 sm:$0xff]   ;;  %v3899_v5 = vld [vmem:[#allocation9 + $0x270] ss:$12 sps:$4 sm:$0xff]  }
  0x3f   :  { %1513 = vmatprep.subr.bf16.mxu1 %v3848_v21  ;;  %v3896_v2 = vld [vmem:[#allocation9 + $0x274] ss:$12 sps:$4 sm:$0xff]   ;;  %v3900_v6 = vld [vmem:[#allocation9 + $0xdc] ss:$12 sps:$4 sm:$0xff]   ;;  %v3904_v8 = vld [vmem:[#allocation9 + $0xd8] ss:$12 sps:$4 sm:$0xff]  }
  0x40   :  { %v118_v59 = vcombine.high %v110_v55, %v110_v55  ;;  %v119_v0 = vcombine.high %v117_v60, %v117_v60  ;;  %v3902_v7 = vld [vmem:[#allocation9 + $0x25c] ss:$12 sps:$4 sm:$0xff]   ;;  %v3905_v9 = vld [vmem:[#allocation9 + $0x258] ss:$12 sps:$4 sm:$0xff]   ;;  %v3910_v12 = vld [vmem:[#allocation9 + $0xc0] ss:$12 sps:$4 sm:$0xff]   ;;  %v4503_v16 = vpack.c.bf16 %v110_v55, %v110_v55  ;;  %v4505_v17 = vpack.c.bf16 %v117_v60, %v117_v60 }
  0x41   :  { %1473 = vmatpush1.bf16.msra.mxu0 %v3850_v22  ;;  %v3906_v10 = vld [vmem:[#allocation9 + $0xc4] ss:$12 sps:$4 sm:$0xff]   ;;  %v3911_v13 = vld [vmem:[#allocation9 + $0x240] ss:$12 sps:$4 sm:$0xff]   ;;  %v3913_v18 = vld [vmem:[#allocation9 + $0x3a8] ss:$12 sps:$4 sm:$0xff]  }
  0x42   :  { %1514 = vmatpush1.bf16.msra.mxu1 %v3851_v23  ;;  %1474 = vmatprep.subr.bf16.mxu0 %v3852_v24  ;;  %v4497_v63 = vpack.c.bf16 %v118_v59, %v118_v59  ;;  %v4500_v3 = vpack.c.bf16 %v119_v0, %v119_v0  ;;  %v3908_v11 = vld [vmem:[#allocation9 + $0x244] ss:$12 sps:$4 sm:$0xff]   ;;  %v3915_v14 = vld [vmem:[#allocation9 + $0x3ac] ss:$12 sps:$4 sm:$0xff]   ;;  %v3916_v19 = vld [vmem:[#allocation9 + $0x528] ss:$12 sps:$4 sm:$0xff]  }
  0x43   :  { %1515 = vmatprep.subr.bf16.mxu1 %v3854_v25  ;;  %v3918_v15 = vld [vmem:[#allocation9 + $0x52c] ss:$12 sps:$4 sm:$0xff]   ;;  %v3921_v20 = vld [vmem:[#allocation9 + $0x394] ss:$12 sps:$4 sm:$0xff]   ;;  %v3919_v22 = vld [vmem:[#allocation9 + $0x390] ss:$12 sps:$4 sm:$0xff]  }
  0x44   :  { %1494 = vmatprep.mubr.bf16.mxu0 %v4497_v63  ;;  %1535 = vmatprep.mubr.bf16.mxu1 %v4500_v3  ;;  %v3924_v21 = vld [vmem:[#allocation9 + $0x514] ss:$12 sps:$4 sm:$0xff]   ;;  %v3922_v23 = vld [vmem:[#allocation9 + $0x510] ss:$12 sps:$4 sm:$0xff]   ;;  %s90_s23 = sshll.u32 %s4428_s22, 4  ;;  %s4378_s24 = scalar_lea.vmem %s79_s21, 9216  ;;  %s91_s23 = int_to_ptr.vmem [resolvable:$true] %s90_s23 }
  0x45   :  { %1475 = vmatpush1.bf16.msra.mxu0 %v3856_v26  ;;  %v3927_v24 = vld [vmem:[#allocation9 + $0x37c] ss:$12 sps:$4 sm:$0xff]   ;;  %v3925_v26 = vld [vmem:[#allocation9 + $0x378] ss:$12 sps:$4 sm:$0xff]   ;;  %v3948_v37 = vld [vmem:[#allocation9 + $0x4b4] ss:$12 sps:$4 sm:$0xff]   ;;  %p4379_p1 = scmp.ne.s32.totalorder %s79_s21, %s4378_s24  ;;  %p4384_p3 = scmp.lt.s32.totalorder %s4378_s24, %s4378_s24 }
  0x46   :  { %1516 = vmatpush1.bf16.msra.mxu1 %v3857_v27  ;;  %1476 = vmatprep.subr.bf16.mxu0 %v3858_v28  ;;  %v3930_v25 = vld [vmem:[#allocation9 + $0x4fc] ss:$12 sps:$4 sm:$0xff]   ;;  %v3928_v27 = vld [vmem:[#allocation9 + $0x4f8] ss:$12 sps:$4 sm:$0xff]  }
  0x47   :  { %1517 = vmatprep.subr.bf16.mxu1 %v3860_v29  ;;  %v3933_v28 = vld [vmem:[#allocation9 + $0x364] ss:$12 sps:$4 sm:$0xff]   ;;  %v100_v43 = vld [vmem:[#allocation8 + $0x8] sm:$0xff]  ;;  %v3961_v60 = vld [vmem:[#allocation9 + $0x468] ss:$12 sps:$4 sm:$0xff]   ;;  %p4385_p4 = por %p4384_p3, %p4383_p2 }
  0x48   :  { %v3936_v29 = vld [vmem:[#allocation9 + $0x4e4] ss:$12 sps:$4 sm:$0xff]  }
  0x49   :  { %1477 = vmatpush1.bf16.msra.mxu0 %v3862_v30  ;;  %v3931_v30 = vld [vmem:[#allocation9 + $0x360] ss:$12 sps:$4 sm:$0xff]   ;;  %v3943_v38 = vld [vmem:[#allocation9 + $0x330] ss:$12 sps:$4 sm:$0xff]   ;;  %p4386_p5 = pnand %p4385_p4, %p4379_p1 }
  0x4a   :  { %1518 = vmatpush1.bf16.msra.mxu1 %v3863_v31  ;;  %1478 = vmatprep.subr.bf16.mxu0 %v3864_v32  ;;  %v3934_v31 = vld [vmem:[#allocation9 + $0x4e0] ss:$12 sps:$4 sm:$0xff]   ;;  %v3946_v39 = vld [vmem:[#allocation9 + $0x4b0] ss:$12 sps:$4 sm:$0xff]  }
  0x4b   :  { %1519 = vmatprep.subr.bf16.mxu1 %v3866_v33  ;;  %v3939_v32 = vld [vmem:[#allocation9 + $0x34c] ss:$12 sps:$4 sm:$0xff]   ;;  %v3967_v0 = vld [vmem:[#allocation9 + $0x450] ss:$12 sps:$4 sm:$0xff]  }
  0x4c   :  { %v3942_v33 = vld [vmem:[#allocation9 + $0x4cc] ss:$12 sps:$4 sm:$0xff]  }
  0x4d   :  { %1479 = vmatpush2.bf16.msra.mxu0 %v3868_v34  ;;  %v3937_v34 = vld [vmem:[#allocation9 + $0x348] ss:$12 sps:$4 sm:$0xff]  }
  0x4e   :  { %1520 = vmatpush2.bf16.msra.mxu1 %v3869_v35  ;;  %1480 = vmatprep.subr.bf16.mxu0 %v3870_v36  ;;  %v3940_v35 = vld [vmem:[#allocation9 + $0x4c8] ss:$12 sps:$4 sm:$0xff]  }
  0x4f   :  { %1521 = vmatprep.subr.bf16.mxu1 %v3872_v40  ;;  %v3945_v36 = vld [vmem:[#allocation9 + $0x334] ss:$12 sps:$4 sm:$0xff]   ;;  %v3951_v40 = vld [vmem:[#allocation9 + $0x31c] ss:$12 sps:$4 sm:$0xff]  }
  0x51   :  { %1481 = vmatpush2.bf16.msra.mxu0 %v3874_v41  ;;  %v3954_v41 = vld [vmem:[#allocation9 + $0x49c] ss:$12 sps:$4 sm:$0xff]  }
  0x52   :  { %1522 = vmatpush2.bf16.msra.mxu1 %v3875_v42  ;;  %1482 = vmatprep.subr.bf16.mxu0 %v3876_v45  ;;  %v3949_v42 = vld [vmem:[#allocation9 + $0x318] ss:$12 sps:$4 sm:$0xff]  }
  0x53   :  { %1523 = vmatprep.subr.bf16.mxu1 %v3878_v46  ;;  %v3952_v45 = vld [vmem:[#allocation9 + $0x498] ss:$12 sps:$4 sm:$0xff]   ;;  %v4510_v46 = vrot.slane %v100_v43, %v4493_v50 }
  0x55   :  { %1483 = vmatpush2.bf16.msra.mxu0 %v3880_v47  ;;  %v120_v47 = vcombine.high %v100_v43, %v100_v43  ;;  %v4022_v43 = vld [vmem:[#allocation9 + $0x128] ss:$12 sps:$4 sm:$0xff]  }
  0x56   :  { %1524 = vmatpush2.bf16.msra.mxu1 %v3881_v48  ;;  %1484 = vmatprep.subr.bf16.mxu0 %v3882_v49  ;;  %v3957_v48 = vld [vmem:[#allocation9 + $0x304] ss:$12 sps:$4 sm:$0xff]  }
  0x57   :  { %1525 = vmatprep.subr.bf16.mxu1 %v3884_v51  ;;  %v3960_v49 = vld [vmem:[#allocation9 + $0x484] ss:$12 sps:$4 sm:$0xff]   ;;  %v135_v51 = vcombine.high %v4510_v46, %v4510_v46  ;;  %v4515_v52 = vrot.slane %v120_v47, %v4493_v50  ;;  %v3964_v50 = vld [vmem:[#allocation9 + $0x5e8] ss:$12 sps:$4 sm:$0xff]  }
  0x58   :  { %v4025_v47 = vld [vmem:[#allocation9 + $0x1e8] ss:$12 sps:$4 sm:$0xff]  }
  0x59   :  { %1485 = vmatpush2.bf16.msra.mxu0 %v3886_v53  ;;  %v3955_v53 = vld [vmem:[#allocation9 + $0x300] ss:$12 sps:$4 sm:$0xff]   ;;  %v4517_v55 = vpack.c.bf16 %v135_v51, %v135_v51  ;;  %v136_v56 = vcombine.high %v4515_v52, %v4515_v52  ;;  %v4028_v51 = vld [vmem:[#allocation9 + $0x50] ss:$12 sps:$4 sm:$0xff]  }
  0x5a   :  { %1526 = vmatpush2.bf16.msra.mxu1 %v3887_v54  ;;  %1486 = vmatprep.subr.bf16.mxu0 %v3888_v57  ;;  %v3958_v54 = vld [vmem:[#allocation9 + $0x480] ss:$12 sps:$4 sm:$0xff]  }
  0x5b   :  { %1527 = vmatprep.subr.bf16.mxu1 %v3890_v58  ;;  %v3963_v57 = vld [vmem:[#allocation9 + $0x46c] ss:$12 sps:$4 sm:$0xff]   ;;  %v4521_v59 = vpack.c.bf16 %v136_v56, %v136_v56 }
  0x5c   :  { %v3966_v58 = vld [vmem:[#allocation9 + $0x5ec] ss:$12 sps:$4 sm:$0xff]  }
  0x5d   :  { %1487 = vmatpush2.bf16.msra.mxu0 %v3892_v61  ;;  %v3969_v61 = vld [vmem:[#allocation9 + $0x454] ss:$12 sps:$4 sm:$0xff]  }
  0x5e   :  { %1528 = vmatpush2.bf16.msra.mxu1 %v3893_v62  ;;  %1488 = vmatprep.subr.bf16.mxu0 %v3894_v1  ;;  %v3972_v62 = vld [vmem:[#allocation9 + $0x5d4] ss:$12 sps:$4 sm:$0xff]   ;;  %v3970_v1 = vld [vmem:[#allocation9 + $0x5d0] ss:$12 sps:$4 sm:$0xff]  }
  0x5f   :  { %1529 = vmatprep.subr.bf16.mxu1 %v3896_v2  ;;  %v3975_v2 = vld [vmem:[#allocation9 + $0x43c] ss:$12 sps:$4 sm:$0xff]   ;;  %v4034_v56 = vld [vmem:[#allocation9 + $0xe0] ss:$12 sps:$4 sm:$0xff]  }
  0x61   :  { %1489 = vmatpush2.bf16.msra.mxu0 %v3898_v4  ;;  %v3978_v4 = vld [vmem:[#allocation9 + $0x5bc] ss:$12 sps:$4 sm:$0xff]  }
  0x62   :  { %1530 = vmatpush2.bf16.msra.mxu1 %v3899_v5  ;;  %1490 = vmatprep.subr.bf16.mxu0 %v3900_v6  ;;  %v3973_v5 = vld [vmem:[#allocation9 + $0x438] ss:$12 sps:$4 sm:$0xff]  }
  0x63   :  { %1531 = vmatprep.subr.bf16.mxu1 %v3902_v7  ;;  %v3976_v6 = vld [vmem:[#allocation9 + $0x5b8] ss:$12 sps:$4 sm:$0xff]  }
  0x64   :  { %v3981_v7 = vld [vmem:[#allocation9 + $0x424] ss:$12 sps:$4 sm:$0xff]  }
  0x65   :  { %1491 = vmatpush2.bf16.msra.mxu0 %v3904_v8  ;;  %v3984_v8 = vld [vmem:[#allocation9 + $0x5a4] ss:$12 sps:$4 sm:$0xff]  }
  0x66   :  { %1532 = vmatpush2.bf16.msra.mxu1 %v3905_v9  ;;  %1492 = vmatprep.subr.bf16.mxu0 %v3906_v10  ;;  %v3979_v9 = vld [vmem:[#allocation9 + $0x420] ss:$12 sps:$4 sm:$0xff]  }
  0x67   :  { %1533 = vmatprep.subr.bf16.mxu1 %v3908_v11  ;;  %v3982_v10 = vld [vmem:[#allocation9 + $0x5a0] ss:$12 sps:$4 sm:$0xff]  }
  0x68   :  { %v3987_v11 = vld [vmem:[#allocation9 + $0x40c] ss:$12 sps:$4 sm:$0xff]  }
  0x69   :  { %1493 = vmatpush2.bf16.msra.mxu0 %v3910_v12  ;;  %v3990_v12 = vld [vmem:[#allocation9 + $0x58c] ss:$12 sps:$4 sm:$0xff]  }
  0x6a   :  { %1534 = vmatpush2.bf16.msra.mxu1 %v3911_v13  ;;  %1544 = vmatprep.subr.bf16.mxu0 %v3915_v14  ;;  %v3985_v13 = vld [vmem:[#allocation9 + $0x408] ss:$12 sps:$4 sm:$0xff]  }
  0x6b   :  { %1585 = vmatprep.subr.bf16.mxu1 %v3918_v15  ;;  %v3988_v14 = vld [vmem:[#allocation9 + $0x588] ss:$12 sps:$4 sm:$0xff]  }
  0x6c   :  { %1495 = vmatmul.mubr.bf16.vlgmr.msra.gmra.mxu0 %v4503_v16  ;;  %v3993_v15 = vld [vmem:[#allocation9 + $0x3f4] ss:$12 sps:$4 sm:$0xff]  }
  0x6d   :  { %1536 = vmatmul.mubr.bf16.vlgmr.msra.gmra.mxu1 %v4505_v17  ;;  %1545 = vmatpush1.bf16.msra.mxu0 %v3913_v18  ;;  %v3996_v18 = vld [vmem:[#allocation9 + $0x574] ss:$12 sps:$4 sm:$0xff]  }
  0x6e   :  { %1586 = vmatpush1.bf16.msra.mxu1 %v3916_v19  ;;  %1546 = vmatprep.subr.bf16.mxu0 %v3921_v20  ;;  %v3991_v19 = vld [vmem:[#allocation9 + $0x3f0] ss:$12 sps:$4 sm:$0xff]  }
  0x6f   :  { %1587 = vmatprep.subr.bf16.mxu1 %v3924_v21  ;;  %1576 = vmatprep.mubr.bf16.mxu0 %v4517_v55  ;;  %v3994_v20 = vld [vmem:[#allocation9 + $0x570] ss:$12 sps:$4 sm:$0xff]  }
  0x70   :  { %1617 = vmatprep.mubr.bf16.mxu1 %v4521_v59  ;;  %v3999_v21 = vld [vmem:[#allocation9 + $0x3dc] ss:$12 sps:$4 sm:$0xff]  }
  0x71   :  { %1547 = vmatpush1.bf16.msra.mxu0 %v3919_v22  ;;  %v4002_v22 = vld [vmem:[#allocation9 + $0x55c] ss:$12 sps:$4 sm:$0xff]  }
  0x72   :  { %1588 = vmatpush1.bf16.msra.mxu1 %v3922_v23  ;;  %1548 = vmatprep.subr.bf16.mxu0 %v3927_v24  ;;  %v3997_v23 = vld [vmem:[#allocation9 + $0x3d8] ss:$12 sps:$4 sm:$0xff]  }
  0x73   :  { %1589 = vmatprep.subr.bf16.mxu1 %v3930_v25  ;;  %v4000_v24 = vld [vmem:[#allocation9 + $0x558] ss:$12 sps:$4 sm:$0xff]  }
  0x74   :  { %v4005_v25 = vld [vmem:[#allocation9 + $0x3c4] ss:$12 sps:$4 sm:$0xff]  }
  0x75   :  { %1549 = vmatpush1.bf16.msra.mxu0 %v3925_v26  ;;  %v4008_v26 = vld [vmem:[#allocation9 + $0x544] ss:$12 sps:$4 sm:$0xff]  }
  0x76   :  { %1590 = vmatpush1.bf16.msra.mxu1 %v3928_v27  ;;  %1550 = vmatprep.subr.bf16.mxu0 %v3933_v28  ;;  %v4003_v27 = vld [vmem:[#allocation9 + $0x3c0] ss:$12 sps:$4 sm:$0xff]  }
  0x77   :  { %1591 = vmatprep.subr.bf16.mxu1 %v3936_v29  ;;  %v4006_v28 = vld [vmem:[#allocation9 + $0x540] ss:$12 sps:$4 sm:$0xff]   ;;  %v4010_v29 = vld [vmem:[#allocation9 + $0x170] ss:$12 sps:$4 sm:$0xff]  }
  0x79   :  { %1551 = vmatpush1.bf16.msra.mxu0 %v3931_v30  ;;  %v4011_v30 = vld [vmem:[#allocation9 + $0x2f0] ss:$12 sps:$4 sm:$0xff]  }
  0x7a   :  { %1592 = vmatpush1.bf16.msra.mxu1 %v3934_v31  ;;  %1552 = vmatprep.subr.bf16.mxu0 %v3939_v32  ;;  %v4012_v31 = vld [vmem:[#allocation9 + $0xb0] ss:$12 sps:$4 sm:$0xff]   ;;  %v4527_v32 = vpack.c.bf16 %v4510_v46, %v4510_v46  ;;  %v4024_v46 = vld [vmem:[#allocation9 + $0x68] ss:$12 sps:$4 sm:$0xff]  }
  0x7b   :  { %1593 = vmatprep.subr.bf16.mxu1 %v3942_v33  ;;  %v4531_v33 = vpack.c.bf16 %v4515_v52, %v4515_v52  ;;  %v4029_v52 = vld [vmem:[#allocation9 + $0x1d0] ss:$12 sps:$4 sm:$0xff]  }
  0x7d   :  { %1553 = vmatpush1.bf16.msra.mxu0 %v3937_v34  ;;  %v4013_v34 = vld [vmem:[#allocation9 + $0x230] ss:$12 sps:$4 sm:$0xff]  }
  0x7e   :  { %1594 = vmatpush1.bf16.msra.mxu1 %v3940_v35  ;;  %1554 = vmatprep.subr.bf16.mxu0 %v3945_v36  ;;  %v4014_v35 = vld [vmem:[#allocation9 + $0x158] ss:$12 sps:$4 sm:$0xff]  }
  0x7f   :  { %1595 = vmatprep.subr.bf16.mxu1 %v3948_v37  ;;  %v4015_v36 = vld [vmem:[#allocation9 + $0x2d8] ss:$12 sps:$4 sm:$0xff]  }
  0x80   :  { %v4016_v37 = vld [vmem:[#allocation9 + $0x98] ss:$12 sps:$4 sm:$0xff]  }
  0x81   :  { %1555 = vmatpush1.bf16.msra.mxu0 %v3943_v38  ;;  %v4017_v38 = vld [vmem:[#allocation9 + $0x218] ss:$12 sps:$4 sm:$0xff]  }
  0x82   :  { %1596 = vmatpush1.bf16.msra.mxu1 %v3946_v39  ;;  %1556 = vmatprep.subr.bf16.mxu0 %v3951_v40  ;;  %v4018_v39 = vld [vmem:[#allocation9 + $0x140] ss:$12 sps:$4 sm:$0xff]  }
  0x83   :  { %1597 = vmatprep.subr.bf16.mxu1 %v3954_v41  ;;  %v4019_v40 = vld [vmem:[#allocation9 + $0x2c0] ss:$12 sps:$4 sm:$0xff]  }
  0x84   :  { %v4020_v41 = vld [vmem:[#allocation9 + $0x80] ss:$12 sps:$4 sm:$0xff]  }
  0x85   :  { %1557 = vmatpush1.bf16.msra.mxu0 %v3949_v42  ;;  %v4021_v42 = vld [vmem:[#allocation9 + $0x200] ss:$12 sps:$4 sm:$0xff]  }
  0x86   :  { %1598 = vmatpush1.bf16.msra.mxu1 %v3952_v45  ;;  %1558 = vmatprep.subr.bf16.mxu0 %v3957_v48  ;;  %v4023_v45 = vld [vmem:[#allocation9 + $0x2a8] ss:$12 sps:$4 sm:$0xff]   ;;  %v4026_v48 = vld [vmem:[#allocation9 + $0x110] ss:$12 sps:$4 sm:$0xff]  }
  0x87   :  { %1599 = vmatprep.subr.bf16.mxu1 %v3960_v49  ;;  %v4027_v49 = vld [vmem:[#allocation9 + $0x290] ss:$12 sps:$4 sm:$0xff]  }
  0x89   :  { %1559 = vmatpush1.bf16.msra.mxu0 %v3955_v53  ;;  %v4032_v53 = vld [vmem:[#allocation9 + $0x38] ss:$12 sps:$4 sm:$0xff]  }
  0x8a   :  { %1600 = vmatpush1.bf16.msra.mxu1 %v3958_v54  ;;  %1560 = vmatprep.subr.bf16.mxu0 %v3963_v57  ;;  %v4033_v54 = vld [vmem:[#allocation9 + $0x1b8] ss:$12 sps:$4 sm:$0xff]   ;;  %v4035_v57 = vld [vmem:[#allocation9 + $0x260] ss:$12 sps:$4 sm:$0xff]  }
  0x8b   :  { %1601 = vmatprep.subr.bf16.mxu1 %v3966_v58  ;;  %v4036_v58 = vld [vmem:[#allocation9 + $0x20] ss:$12 sps:$4 sm:$0xff]  }
  0x8d   :  { %1561 = vmatpush2.bf16.msra.mxu0 %v3961_v60  ;;  %v4037_v60 = vld [vmem:[#allocation9 + $0x1a0] ss:$12 sps:$4 sm:$0xff]  }
  0x8e   :  { %1602 = vmatpush2.bf16.msra.mxu1 %v3964_v50  ;;  %1562 = vmatprep.subr.bf16.mxu0 %v3969_v61  ;;  %v4038_v50 = vld [vmem:[#allocation9 + $0xc8] ss:$12 sps:$4 sm:$0xff]  }
  0x8f   :  { %1603 = vmatprep.subr.bf16.mxu1 %v3972_v62  ;;  %v4039_v61 = vld [vmem:[#allocation9 + $0x248] ss:$12 sps:$4 sm:$0xff]  }
  0x90   :  { %v4040_v62 = vld [vmem:[#allocation9 + $0x8] ss:$12 sps:$4 sm:$0xff]  }
  0x91   :  { %1563 = vmatpush2.bf16.msra.mxu0 %v3967_v0  ;;  %v4041_v0 = vld [vmem:[#allocation9 + $0x188] ss:$12 sps:$4 sm:$0xff]  }
  0x92   :  { %1604 = vmatpush2.bf16.msra.mxu1 %v3970_v1  ;;  %1564 = vmatprep.subr.bf16.mxu0 %v3975_v2  ;;  %v4042_v1 = vld [vmem:[#allocation9 + $0x470] ss:$12 sps:$4 sm:$0xff]  }
  0x93   :  { %1605 = vmatprep.subr.bf16.mxu1 %v3978_v4  ;;  %v4043_v2 = vld [vmem:[#allocation9 + $0x5f0] ss:$12 sps:$4 sm:$0xff]  }
  0x94   :  { %v4044_v4 = vld [vmem:[#allocation9 + $0x3b0] ss:$12 sps:$4 sm:$0xff]  }
  0x95   :  { %1565 = vmatpush2.bf16.msra.mxu0 %v3973_v5  ;;  %v4045_v5 = vld [vmem:[#allocation9 + $0x530] ss:$12 sps:$4 sm:$0xff]  }
  0x96   :  { %1606 = vmatpush2.bf16.msra.mxu1 %v3976_v6  ;;  %1566 = vmatprep.subr.bf16.mxu0 %v3981_v7  ;;  %v4046_v6 = vld [vmem:[#allocation9 + $0x458] ss:$12 sps:$4 sm:$0xff]  }
  0x97   :  { %1607 = vmatprep.subr.bf16.mxu1 %v3984_v8  ;;  %v4047_v7 = vld [vmem:[#allocation9 + $0x5d8] ss:$12 sps:$4 sm:$0xff]  }
  0x98   :  { %v4048_v8 = vld [vmem:[#allocation9 + $0x398] ss:$12 sps:$4 sm:$0xff]  }
  0x99   :  { %1567 = vmatpush2.bf16.msra.mxu0 %v3979_v9  ;;  %v4049_v9 = vld [vmem:[#allocation9 + $0x518] ss:$12 sps:$4 sm:$0xff]  }
  0x9a   :  { %1608 = vmatpush2.bf16.msra.mxu1 %v3982_v10  ;;  %1568 = vmatprep.subr.bf16.mxu0 %v3987_v11  ;;  %v4050_v10 = vld [vmem:[#allocation9 + $0x440] ss:$12 sps:$4 sm:$0xff]  }
  0x9b   :  { %1609 = vmatprep.subr.bf16.mxu1 %v3990_v12  ;;  %v4051_v11 = vld [vmem:[#allocation9 + $0x5c0] ss:$12 sps:$4 sm:$0xff]  }
  0x9c   :  { %v4052_v12 = vld [vmem:[#allocation9 + $0x380] ss:$12 sps:$4 sm:$0xff]  }
  0x9d   :  { %1569 = vmatpush2.bf16.msra.mxu0 %v3985_v13  ;;  %v4053_v13 = vld [vmem:[#allocation9 + $0x500] ss:$12 sps:$4 sm:$0xff]  }
  0x9e   :  { %1610 = vmatpush2.bf16.msra.mxu1 %v3988_v14  ;;  %1570 = vmatprep.subr.bf16.mxu0 %v3993_v15  ;;  %v4056_v14 = vld [vmem:[#allocation9 + $0x368] ss:$12 sps:$4 sm:$0xff]  }
  0x9f   :  { %1611 = vmatprep.subr.bf16.mxu1 %v3996_v18  ;;  %v4057_v15 = vld [vmem:[#allocation9 + $0x4e8] ss:$12 sps:$4 sm:$0xff]   ;;  %v4058_v18 = vld [vmem:[#allocation9 + $0x410] ss:$12 sps:$4 sm:$0xff]  }
  0xa1   :  { %1571 = vmatpush2.bf16.msra.mxu0 %v3991_v19  ;;  %v4059_v19 = vld [vmem:[#allocation9 + $0x590] ss:$12 sps:$4 sm:$0xff]  }
  0xa2   :  { %1612 = vmatpush2.bf16.msra.mxu1 %v3994_v20  ;;  %1572 = vmatprep.subr.bf16.mxu0 %v3999_v21  ;;  %v4062_v20 = vld [vmem:[#allocation9 + $0x3f8] ss:$12 sps:$4 sm:$0xff]  }
  0xa3   :  { %1613 = vmatprep.subr.bf16.mxu1 %v4002_v22  ;;  %v4063_v21 = vld [vmem:[#allocation9 + $0x578] ss:$12 sps:$4 sm:$0xff]  }
  0xa4   :  { %v4064_v22 = vld [vmem:[#allocation9 + $0x338] ss:$12 sps:$4 sm:$0xff]  }
  0xa5   :  { %1573 = vmatpush2.bf16.msra.mxu0 %v3997_v23  ;;  %v4065_v23 = vld [vmem:[#allocation9 + $0x4b8] ss:$12 sps:$4 sm:$0xff]  }
  0xa6   :  { %1614 = vmatpush2.bf16.msra.mxu1 %v4000_v24  ;;  %1574 = vmatprep.subr.bf16.mxu0 %v4005_v25  ;;  %v4066_v24 = vld [vmem:[#allocation9 + $0x3e0] ss:$12 sps:$4 sm:$0xff]  }
  0xa7   :  { %1615 = vmatprep.subr.bf16.mxu1 %v4008_v26  ;;  %v4067_v25 = vld [vmem:[#allocation9 + $0x560] ss:$12 sps:$4 sm:$0xff]  }
  0xa8   :  { %v4068_v26 = vld [vmem:[#allocation9 + $0x320] ss:$12 sps:$4 sm:$0xff]  }
  0xa9   :  { %1575 = vmatpush2.bf16.msra.mxu0 %v4003_v27  ;;  %v4069_v27 = vld [vmem:[#allocation9 + $0x4a0] ss:$12 sps:$4 sm:$0xff]  }
  0xaa   :  { %1616 = vmatpush2.bf16.msra.mxu1 %v4006_v28  ;;  %3614 = vmatprep.subr.bf16.mxu0 %v4010_v29  ;;  %v4070_v28 = vld [vmem:[#allocation9 + $0x3c8] ss:$12 sps:$4 sm:$0xff]  }
  0xab   :  { %3636 = vmatprep.subr.bf16.mxu1 %v4011_v30  ;;  %v4071_v29 = vld [vmem:[#allocation9 + $0x548] ss:$12 sps:$4 sm:$0xff]  }
  0xac   :  { %1577 = vmatmul.mubr.bf16.vlgmr.msra.gmra.mxu0 %v4527_v32  ;;  %v4072_v30 = vld [vmem:[#allocation9 + $0x308] ss:$12 sps:$4 sm:$0xff]  }
  0xad   :  { %1618 = vmatmul.mubr.bf16.vlgmr.msra.gmra.mxu1 %v4531_v33  ;;  %3615 = vmatpush3.bf16.msra.mxu0 %v4012_v31  ;;  %v4073_v31 = vld [vmem:[#allocation9 + $0x488] ss:$12 sps:$4 sm:$0xff]  }
  0xae   :  { %3637 = vmatpush3.bf16.msra.mxu1 %v4013_v34  ;;  %3616 = vmatprep.subr.bf16.mxu0 %v4014_v35  ;;  %v4544_v34 = vsub.s32 0, %v4490_v44  ;;  %v4546_v35 = vld [vmem:[#allocation11] sm:$0x77] }
  0xaf   :  { %3638 = vmatprep.subr.bf16.mxu1 %v4015_v36  ;;  %1658 = vmatprep.mubr.bf16.mxu0 %v4497_v63  ;;  %v4030_v63 = vld [vmem:[#allocation9 + $0xf8] ss:$12 sps:$4 sm:$0xff]   ;;  %v417_v36 = vsub.s32 4, %v4490_v44 }
  0xb0   :  { %1698 = vmatprep.mubr.bf16.mxu1 %v4500_v3  ;;  %v4031_v3 = vld [vmem:[#allocation9 + $0x278] ss:$12 sps:$4 sm:$0xff]  }
  0xb1   :  { %3617 = vmatpush3.bf16.msra.mxu0 %v4016_v37  ;;  %v414_v37 = vrot.slane %v4546_v35, %v4544_v34 }
  0xb2   :  { %3639 = vmatpush3.bf16.msra.mxu1 %v4017_v38  ;;  %3618 = vmatprep.subr.bf16.mxu0 %v4018_v39  ;;  %v418_v38 = vrot.slane %v4546_v35, %v417_v36 }
  0xb3   :  { %3640 = vmatprep.subr.bf16.mxu1 %v4019_v40  ;;  %v429_v39 = vrot.slane %v414_v37, %v4544_v34 }
  0xb4   :  { %v433_v40 = vrot.slane %v418_v38, %v4544_v34 }
  0xb5   :  { %3619 = vmatpush3.bf16.msra.mxu0 %v4020_v41 }
  0xb6   :  { %3641 = vmatpush3.bf16.msra.mxu1 %v4021_v42  ;;  %3620 = vmatprep.subr.bf16.mxu0 %v4022_v43 }
  0xb7   :  { %3642 = vmatprep.subr.bf16.mxu1 %v4023_v45 }
  0xb9   :  { %3621 = vmatpush3.bf16.msra.mxu0 %v4024_v46 }
  0xba   :  { %3643 = vmatpush3.bf16.msra.mxu1 %v4025_v47  ;;  %3622 = vmatprep.subr.bf16.mxu0 %v4026_v48 }
  0xbb   :  { %3644 = vmatprep.subr.bf16.mxu1 %v4027_v49 }
  0xbd   :  { %3623 = vmatpush3.bf16.msra.mxu0 %v4028_v51 }
  0xbe   :  { %3645 = vmatpush3.bf16.msra.mxu1 %v4029_v52  ;;  %3624 = vmatprep.subr.bf16.mxu0 %v4030_v63 }
  0xbf   :  { %3646 = vmatprep.subr.bf16.mxu1 %v4031_v3 }
  0xc1   :  { %3625 = vmatpush3.bf16.msra.mxu0 %v4032_v53 }
  0xc2   :  { %3647 = vmatpush3.bf16.msra.mxu1 %v4033_v54  ;;  %3626 = vmatprep.subr.bf16.mxu0 %v4034_v56 }
  0xc3   :  { %3648 = vmatprep.subr.bf16.mxu1 %v4035_v57 }
  0xc5   :  { %3627 = vmatpush3.bf16.msra.mxu0 %v4036_v58 }
  0xc6   :  { %3649 = vmatpush3.bf16.msra.mxu1 %v4037_v60  ;;  %3628 = vmatprep.subr.bf16.mxu0 %v4038_v50 }
  0xc7   :  { %3650 = vmatprep.subr.bf16.mxu1 %v4039_v61 }
  0xc9   :  { %3629 = vmatpush3.bf16.msra.mxu0 %v4040_v62 }
  0xca   :  { %3651 = vmatpush3.bf16.msra.mxu1 %v4041_v0  ;;  %3658 = vmatprep.subr.bf16.mxu0 %v4042_v1 }
  0xcb   :  { %3680 = vmatprep.subr.bf16.mxu1 %v4043_v2 }
  0xcc   :  { %1659 = vmatmul.mubr.bf16.vlgmr.msra.gmra.mxu0 %v4503_v16  ;;  %v4054_v16 = vld [vmem:[#allocation9 + $0x428] ss:$12 sps:$4 sm:$0xff]  }
  0xcd   :  { %1699 = vmatmul.mubr.bf16.vlgmr.msra.gmra.mxu1 %v4505_v17  ;;  %3659 = vmatpush3.bf16.msra.mxu0 %v4044_v4  ;;  %v4055_v17 = vld [vmem:[#allocation9 + $0x5a8] ss:$12 sps:$4 sm:$0xff]  }
  0xce   :  { %3681 = vmatpush3.bf16.msra.mxu1 %v4045_v5  ;;  %3660 = vmatprep.subr.bf16.mxu0 %v4046_v6 }
  0xcf   :  { %3682 = vmatprep.subr.bf16.mxu1 %v4047_v7  ;;  %1738 = vmatprep.mubr.bf16.mxu0 %v4517_v55  ;;  %v4060_v55 = vld [vmem:[#allocation9 + $0x350] ss:$12 sps:$4 sm:$0xff]  }
  0xd0   :  { %1778 = vmatprep.mubr.bf16.mxu1 %v4521_v59  ;;  %v4061_v59 = vld [vmem:[#allocation9 + $0x4d0] ss:$12 sps:$4 sm:$0xff]  }
  0xd1   :  { %3661 = vmatpush3.bf16.msra.mxu0 %v4048_v8 }
  0xd2   :  { %3683 = vmatpush3.bf16.msra.mxu1 %v4049_v9  ;;  %3662 = vmatprep.subr.bf16.mxu0 %v4050_v10 }
  0xd3   :  { %3684 = vmatprep.subr.bf16.mxu1 %v4051_v11 }
  0xd5   :  { %3663 = vmatpush3.bf16.msra.mxu0 %v4052_v12 }
  0xd6   :  { %3685 = vmatpush3.bf16.msra.mxu1 %v4053_v13  ;;  %3664 = vmatprep.subr.bf16.mxu0 %v4054_v16 }
  0xd7   :  { %3686 = vmatprep.subr.bf16.mxu1 %v4055_v17 }
  0xd9   :  { %3665 = vmatpush3.bf16.msra.mxu0 %v4056_v14 }
  0xda   :  { %3687 = vmatpush3.bf16.msra.mxu1 %v4057_v15  ;;  %3666 = vmatprep.subr.bf16.mxu0 %v4058_v18 }
  0xdb   :  { %3688 = vmatprep.subr.bf16.mxu1 %v4059_v19 }
  0xdd   :  { %3667 = vmatpush3.bf16.msra.mxu0 %v4060_v55 }
  0xde   :  { %3689 = vmatpush3.bf16.msra.mxu1 %v4061_v59  ;;  %3668 = vmatprep.subr.bf16.mxu0 %v4062_v20 }
  0xdf   :  { %3690 = vmatprep.subr.bf16.mxu1 %v4063_v21 }
  0xe1   :  { %3669 = vmatpush3.bf16.msra.mxu0 %v4064_v22 }
  0xe2   :  { %3691 = vmatpush3.bf16.msra.mxu1 %v4065_v23  ;;  %3670 = vmatprep.subr.bf16.mxu0 %v4066_v24 }
  0xe3   :  { %3692 = vmatprep.subr.bf16.mxu1 %v4067_v25 }
  0xe5   :  { %3671 = vmatpush3.bf16.msra.mxu0 %v4068_v26 }
  0xe6   :  { %3693 = vmatpush3.bf16.msra.mxu1 %v4069_v27  ;;  %3672 = vmatprep.subr.bf16.mxu0 %v4070_v28 }
  0xe7   :  { %3694 = vmatprep.subr.bf16.mxu1 %v4071_v29 }
  0xe9   :  { %3673 = vmatpush3.bf16.msra.mxu0 %v4072_v30 }
  0xea   :  { %3695 = vmatpush3.bf16.msra.mxu1 %v4073_v31 }
  0xec   :  { %1739 = vmatmul.mubr.bf16.vlgmr.msra.gmra.mxu0 %v4527_v32 }
  0xed   :  { %1779 = vmatmul.mubr.bf16.vlgmr.msra.gmra.mxu1 %v4531_v33 }
 0x12c   :  { %v1496_v41 = vpop.f32.mrf.mxu0 }
 0x12d   :  { %v1537_v32 = vpop.f32.mrf.mxu1  ;;  %v1497_v42 = vadd.f32 %v1496_v41, %v429_v39 }
 0x12e   :  { %v1498_v33 = vpop.f32.mrf.mxu0 }
 0x12f   :  { %v1539_v43 = vpop.f32.mrf.mxu1  ;;  %v1538_v45 = vadd.f32 %v1537_v32, %v1497_v42  ;;  %v1499_v46 = vadd.f32 %v1498_v33, %v433_v40 }
 0x130   :  { %v1500_v47 = vpop.f32.mrf.mxu0 }
 0x131   :  { %v1541_v48 = vpop.f32.mrf.mxu1  ;;  %v1540_v49 = vadd.f32 %v1539_v43, %v1499_v46 }
 0x132   :  { %v1501_v51 = vpop.f32.mrf.mxu0 }
 0x133   :  { %v1542_v52 = vpop.f32.mrf.mxu1 }
 0x134   :  { %4389 = shalt.err (!%p4386_p5)  }
 0x135   :  { %81 = dma.hbm_to_vmem [thread:$0]  %s4651_s4, 9216, %s79_s21, [#allocation4] }
 0x136   :  { %s4398_s27 = scalar_lea.vmem %s91_s23, 9216  ;;  %p4403_p7 = scmp.lt.s32.totalorder %s91_s23, %s91_s23 }
 0x137   :  { %p4399_p6 = scmp.ne.s32.totalorder %s91_s23, %s4398_s27  ;;  %p4404_p8 = scmp.lt.s32.totalorder %s4398_s27, %s4398_s27 }
 0x139   :  { %p4405_p9 = por %p4404_p8, %p4403_p7 }
 0x13b   :  { %p4406_p10 = pnand %p4405_p9, %p4399_p6 }
 0x13d   :  { %4409 = shalt.err (!%p4406_p10)  }
 0x13e   :  { %93 = dma.hbm_to_vmem [thread:$0]  %s4652_s5, 9216, %s91_s23, [#allocation4 + $0x1]  ;;  %v4562_v55 = vld [vmem:[#allocation11 + $0x8] sm:$0x7] }
 0x13f   :  { %v422_v59 = vrot.slane %v4562_v55, %v4544_v34 }
 0x141   :  { %v437_v20 = vrot.slane %v422_v59, %v4544_v34 }
 0x16c   :  { %v1578_v63 = vpop.f32.mrf.mxu0 }
 0x16d   :  { %v1619_v3 = vpop.f32.mrf.mxu1  ;;  %v1579_v53 = vadd.f32 %v1578_v63, %v1538_v45 }
 0x16e   :  { %v1580_v54 = vpop.f32.mrf.mxu0 }
 0x16f   :  { %v1621_v56 = vpop.f32.mrf.mxu1  ;;  %v1620_v57 = vadd.f32 %v1619_v3, %v1579_v53  ;;  %v1581_v58 = vadd.f32 %v1580_v54, %v1540_v49 }
 0x170   :  { %v1582_v60 = vpop.f32.mrf.mxu0 }
 0x171   :  { %v1623_v50 = vpop.f32.mrf.mxu1  ;;  %v3459_v61 = vmul.f32 -1.442695, %v1620_v57  ;;  %v1622_v62 = vadd.f32 %v1621_v56, %v1581_v58 }
 0x172   :  { %v1583_v0 = vpop.f32.mrf.mxu0 }
 0x173   :  { %v1624_v1 = vpop.f32.mrf.mxu1  ;;  %4074 = vpow2.f32 %v3459_v61  ;;  %v3460_v2 = vmul.f32 -1.442695, %v1622_v62 }
 0x175   :  { %4076 = vpow2.f32 %v3460_v2 }
 0x180   :  { %v4075_v4 = vpop.eup %4074 }
 0x181   :  { %v1795_v5 = vadd.f32 1.0, %v4075_v4 }
 0x182   :  { %v4077_v6 = vpop.eup %4076 }
 0x183   :  { %4078 = vrcp.f32 %v1795_v5  ;;  %v1796_v7 = vadd.f32 1.0, %v4077_v6 }
 0x185   :  { %4080 = vrcp.f32 %v1796_v7 }
 0x18c   :  { %v3630_v8 = vpop.f32.mrf.mxu0 }
 0x18d   :  { %v3652_v9 = vpop.f32.mrf.mxu1 }
 0x18e   :  { %v3631_v10 = vpop.f32.mrf.mxu0 }
 0x18f   :  { %v3653_v11 = vpop.f32.mrf.mxu1  ;;  %v3632_v21 = vadd.f32 %v3631_v10, %v3630_v8 }
 0x190   :  { %v4079_v12 = vpop.eup %4078  ;;  %v3633_v13 = vpop.f32.mrf.mxu0  ;;  %v3654_v23 = vadd.f32 %v3653_v11, %v3652_v9 }
 0x191   :  { %v3655_v16 = vpop.f32.mrf.mxu1  ;;  %v4560_v17 = vmul.f32 %v4079_v12, %v1620_v57  ;;  %v1661_v22 = vadd.f32 %v3632_v21, %v437_v20 }
 0x192   :  { %v4081_v14 = vpop.eup %4080  ;;  %v3634_v15 = vpop.f32.mrf.mxu0 }
 0x193   :  { %v3656_v18 = vpop.f32.mrf.mxu1  ;;  %v1805_v19 = vmul.f32 %v4081_v14, %v1622_v62  ;;  %v1701_v28 = vadd.f32 %v3654_v23, %v1661_v22 }
 0x1ac   :  { %v3674_v24 = vpop.f32.mrf.mxu0 }
 0x1ad   :  { %v3696_v25 = vpop.f32.mrf.mxu1 }
 0x1ae   :  { %v3675_v26 = vpop.f32.mrf.mxu0 }
 0x1af   :  { %v3697_v27 = vpop.f32.mrf.mxu1  ;;  %v3676_v29 = vadd.f32 %v3675_v26, %v3674_v24 }
 0x1b0   :  { %v3677_v30 = vpop.f32.mrf.mxu0  ;;  %v3698_v37 = vadd.f32 %v3697_v27, %v3696_v25 }
 0x1b1   :  { %v3699_v31 = vpop.f32.mrf.mxu1  ;;  %v1741_v36 = vadd.f32 %v3676_v29, %v1701_v28 }
 0x1b2   :  { %v3678_v38 = vpop.f32.mrf.mxu0 }
 0x1b3   :  { %v3700_v39 = vpop.f32.mrf.mxu1  ;;  %v1781_v40 = vadd.f32 %v3698_v37, %v1741_v36 }
 0x1b5   :  { %v3461_v41 = vmul.f32 -1.442695, %v1781_v40 }
 0x1b7   :  { %4082 = vpow2.f32 %v3461_v41 }
 0x1c4   :  { %v4083_v32 = vpop.eup %4082 }
 0x1c5   :  { %v1797_v42 = vadd.f32 1.0, %v4083_v32 }
 0x1c7   :  { %4084 = vrcp.f32 %v1797_v42 }
 0x1d4   :  { %v4085_v33 = vpop.eup %4084 }
 0x1d5   :  { %v4567_v43 = vmul.f32 %v4085_v33, %v1781_v40 }
 0x1d6   :  { %4416 = dma.done.wait [#allocation4], 9216 }
 0x1d7   :  { %4417 = vsyncadd [#allocation4], 4294958080  ;;  %v4569_v45 = vpack.c.bf16 %v1805_v19, %v1805_v19  ;;  %v4429_v46 = vmov 0   ;;  %v4086_v47 = vld [vmem:[#allocation2 + $0xac] ss:$12 sps:$4 sm:$0xff]   ;;  %v4575_v25 = vpack.c.bf16 %v4567_v43, %v4567_v43  ;;  %vm4431_vm0 = vmmov 0  }
 0x1d8   :  { %2367 = vmatprep.mubr.bf16.mxu1 %v4429_v46  ;;  %v4088_v48 = vld [vmem:[#allocation2 + $0xa8] ss:$12 sps:$4 sm:$0xff]   ;;  %2294 = vmatprep.subr.bf16.mxu0 %v4086_v47  ;;  %v4091_v51 = vld [vmem:[#allocation2 + $0x90] ss:$12 sps:$4 sm:$0xff]   ;;  %v4094_v63 = vld [vmem:[#allocation2 + $0x78] ss:$12 sps:$4 sm:$0xff]  }
 0x1d9   :  { %2326 = vmatprep.mubr.bf16.mxu0 %v4569_v45  ;;  %v4089_v49 = vld [vmem:[#allocation2 + $0x94] ss:$12 sps:$4 sm:$0xff]   ;;  %2295 = vmatpush1.bf16.msra.mxu0 %v4088_v48  ;;  %v4092_v52 = vld [vmem:[#allocation2 + $0x7c] ss:$12 sps:$4 sm:$0xff]   ;;  %v4095_v3 = vld [vmem:[#allocation2 + $0x64] ss:$12 sps:$4 sm:$0xff]  }
 0x1da   :  { %2296 = vmatprep.subr.bf16.mxu0 %v4089_v49  ;;  %v4104_v53 = vld [vmem:[#allocation2 + $0x22c] ss:$12 sps:$4 sm:$0xff]   ;;  %v4106_v54 = vld [vmem:[#allocation2 + $0x228] ss:$12 sps:$4 sm:$0xff]   ;;  %v4112_v58 = vld [vmem:[#allocation2 + $0x210] ss:$12 sps:$4 sm:$0xff]  }
 0x1db   :  { %v4097_v56 = vld [vmem:[#allocation2 + $0x60] ss:$12 sps:$4 sm:$0xff]   ;;  %2335 = vmatprep.subr.bf16.mxu1 %v4104_v53  ;;  %v4100_v50 = vld [vmem:[#allocation2 + $0x48] ss:$12 sps:$4 sm:$0xff]   ;;  %v4118_v0 = vld [vmem:[#allocation2 + $0x1f8] ss:$12 sps:$4 sm:$0xff]  }
 0x1dc   :  { %2336 = vmatpush1.bf16.msra.mxu1 %v4106_v54  ;;  %v4110_v57 = vld [vmem:[#allocation2 + $0x214] ss:$12 sps:$4 sm:$0xff]   ;;  %v4098_v60 = vld [vmem:[#allocation2 + $0x4c] ss:$12 sps:$4 sm:$0xff]   ;;  %v4116_v61 = vld [vmem:[#allocation2 + $0x1fc] ss:$12 sps:$4 sm:$0xff]  }
 0x1dd   :  { %2297 = vmatpush1.bf16.msra.mxu0 %v4091_v51  ;;  %2337 = vmatprep.subr.bf16.mxu1 %v4110_v57  ;;  %v4101_v62 = vld [vmem:[#allocation2 + $0x34] ss:$12 sps:$4 sm:$0xff]   ;;  %v4122_v1 = vld [vmem:[#allocation2 + $0x1e4] ss:$12 sps:$4 sm:$0xff]   ;;  %v4107_v4 = vld [vmem:[#allocation2 + $0x1c] ss:$12 sps:$4 sm:$0xff]  }
 0x1de   :  { %2298 = vmatprep.subr.bf16.mxu0 %v4092_v52  ;;  %v4103_v2 = vld [vmem:[#allocation2 + $0x30] ss:$12 sps:$4 sm:$0xff]   ;;  %v4124_v5 = vld [vmem:[#allocation2 + $0x1e0] ss:$12 sps:$4 sm:$0xff]   ;;  %v4109_v7 = vld [vmem:[#allocation2 + $0x18] ss:$12 sps:$4 sm:$0xff]   ;;  %v1811_v52 = vpack.c.bf16 %v4560_v17, %v4560_v17 }
 0x1df   :  { %v4128_v6 = vld [vmem:[#allocation2 + $0x1cc] ss:$12 sps:$4 sm:$0xff]   ;;  %v4113_v8 = vld [vmem:[#allocation2 + $0x4] ss:$12 sps:$4 sm:$0xff]   ;;  %v4130_v9 = vld [vmem:[#allocation2 + $0x1c8] ss:$12 sps:$4 sm:$0xff]  }
 0x1e0   :  { %2338 = vmatpush1.bf16.msra.mxu1 %v4112_v58  ;;  %v4134_v10 = vld [vmem:[#allocation2 + $0x1b4] ss:$12 sps:$4 sm:$0xff]   ;;  %v4119_v12 = vld [vmem:[#allocation2 + $0x16c] ss:$12 sps:$4 sm:$0xff]   ;;  %v4136_v13 = vld [vmem:[#allocation2 + $0x1b0] ss:$12 sps:$4 sm:$0xff]  }
 0x1e1   :  { %2299 = vmatpush1.bf16.msra.mxu0 %v4094_v63  ;;  %2339 = vmatprep.subr.bf16.mxu1 %v4116_v61  ;;  %v4115_v11 = vld [vmem:[#allocation2] ss:$12 sps:$4 sm:$0xff]   ;;  %v4140_v16 = vld [vmem:[#allocation2 + $0x19c] ss:$12 sps:$4 sm:$0xff]   ;;  %v4142_v15 = vld [vmem:[#allocation2 + $0x198] ss:$12 sps:$4 sm:$0xff]  }
 0x1e2   :  { %2300 = vmatprep.subr.bf16.mxu0 %v4095_v3  ;;  %v4121_v14 = vld [vmem:[#allocation2 + $0x168] ss:$12 sps:$4 sm:$0xff]   ;;  %v4146_v19 = vld [vmem:[#allocation2 + $0x184] ss:$12 sps:$4 sm:$0xff]   ;;  %v4148_v21 = vld [vmem:[#allocation2 + $0x180] ss:$12 sps:$4 sm:$0xff]  }
 0x1e3   :  { %v4125_v18 = vld [vmem:[#allocation2 + $0x154] ss:$12 sps:$4 sm:$0xff]   ;;  %v4127_v59 = vld [vmem:[#allocation2 + $0x150] ss:$12 sps:$4 sm:$0xff]   ;;  %v4133_v23 = vld [vmem:[#allocation2 + $0x138] ss:$12 sps:$4 sm:$0xff]  }
 0x1e4   :  { %2340 = vmatpush1.bf16.msra.mxu1 %v4118_v0  ;;  %v4131_v20 = vld [vmem:[#allocation2 + $0x13c] ss:$12 sps:$4 sm:$0xff]   ;;  %v4137_v24 = vld [vmem:[#allocation2 + $0x124] ss:$12 sps:$4 sm:$0xff]   ;;  %v4139_v28 = vld [vmem:[#allocation2 + $0x120] ss:$12 sps:$4 sm:$0xff]  }
 0x1e5   :  { %2301 = vmatpush1.bf16.msra.mxu0 %v4097_v56  ;;  %2341 = vmatprep.subr.bf16.mxu1 %v4122_v1  ;;  %v4152_v22 = vld [vmem:[#allocation2 + $0x170] ss:$12 sps:$4 sm:$0xff]   ;;  %v4157_v27 = vld [vmem:[#allocation2 + $0x158] ss:$12 sps:$4 sm:$0xff]   ;;  %v4162_v31 = vld [vmem:[#allocation2 + $0x140] ss:$12 sps:$4 sm:$0xff]  }
 0x1e6   :  { %2302 = vmatprep.subr.bf16.mxu0 %v4098_v60  ;;  %v4153_v26 = vld [vmem:[#allocation2 + $0xb0] ss:$12 sps:$4 sm:$0xff]   ;;  %v4143_v29 = vld [vmem:[#allocation2 + $0x10c] ss:$12 sps:$4 sm:$0xff]   ;;  %v4145_v36 = vld [vmem:[#allocation2 + $0x108] ss:$12 sps:$4 sm:$0xff]  }
 0x1e7   :  { %v4158_v30 = vld [vmem:[#allocation2 + $0x98] ss:$12 sps:$4 sm:$0xff]   ;;  %v4149_v37 = vld [vmem:[#allocation2 + $0xf4] ss:$12 sps:$4 sm:$0xff]   ;;  %v4151_v40 = vld [vmem:[#allocation2 + $0xf0] ss:$12 sps:$4 sm:$0xff]  }
 0x1e8   :  { %2342 = vmatpush1.bf16.msra.mxu1 %v4124_v5  ;;  %v4163_v38 = vld [vmem:[#allocation2 + $0x80] ss:$12 sps:$4 sm:$0xff]   ;;  %v4165_v39 = vld [vmem:[#allocation2 + $0x128] ss:$12 sps:$4 sm:$0xff]   ;;  %v4168_v42 = vld [vmem:[#allocation2 + $0x110] ss:$12 sps:$4 sm:$0xff]  }
 0x1e9   :  { %2303 = vmatpush1.bf16.msra.mxu0 %v4100_v50  ;;  %2343 = vmatprep.subr.bf16.mxu1 %v4128_v6  ;;  %v4154_v41 = vld [vmem:[#allocation2 + $0xdc] ss:$12 sps:$4 sm:$0xff]   ;;  %v4156_v33 = vld [vmem:[#allocation2 + $0xd8] ss:$12 sps:$4 sm:$0xff]   ;;  %v4161_v48 = vld [vmem:[#allocation2 + $0xc0] ss:$12 sps:$4 sm:$0xff]  }
 0x1ea   :  { %2304 = vmatprep.subr.bf16.mxu0 %v4101_v62  ;;  %v4166_v32 = vld [vmem:[#allocation2 + $0x68] ss:$12 sps:$4 sm:$0xff]   ;;  %v4169_v43 = vld [vmem:[#allocation2 + $0x50] ss:$12 sps:$4 sm:$0xff]   ;;  %v4171_v47 = vld [vmem:[#allocation2 + $0xf8] ss:$12 sps:$4 sm:$0xff]  }
 0x1eb   :  { %v4172_v49 = vld [vmem:[#allocation2 + $0x38] ss:$12 sps:$4 sm:$0xff]   ;;  %v4174_v51 = vld [vmem:[#allocation2 + $0xe0] ss:$12 sps:$4 sm:$0xff]   ;;  %v4164_v63 = vld [vmem:[#allocation2 + $0x230] ss:$12 sps:$4 sm:$0xff]  }
 0x1ec   :  { %2344 = vmatpush1.bf16.msra.mxu1 %v4130_v9  ;;  %v4175_v3 = vld [vmem:[#allocation2 + $0x20] ss:$12 sps:$4 sm:$0xff]   ;;  %v4430_v53 = vmov 0.0   ;;  %v4177_v54 = vld [vmem:[#allocation2 + $0xc8] ss:$12 sps:$4 sm:$0xff]   ;;  %v4593_v5 = vsub.s32 1, %v4490_v44 }
 0x1ed   :  { %2305 = vmatpush1.bf16.msra.mxu0 %v4103_v2  ;;  %2345 = vmatprep.subr.bf16.mxu1 %v4134_v10  ;;  %v4167_v56 = vld [vmem:[#allocation2 + $0x218] ss:$12 sps:$4 sm:$0xff]   ;;  %v4178_v57 = vld [vmem:[#allocation2 + $0x8] ss:$12 sps:$4 sm:$0xff]   ;;  %v4170_v17 = vld [vmem:[#allocation2 + $0x200] ss:$12 sps:$4 sm:$0xff]   ;;  %v2456_v10 = vstv %s4484_s19 }
 0x1ee   :  { %2306 = vmatprep.subr.bf16.mxu0 %v4107_v4  ;;  %v4173_v58 = vld [vmem:[#allocation2 + $0x1e8] ss:$12 sps:$4 sm:$0xff]   ;;  %v4176_v60 = vld [vmem:[#allocation2 + $0x1d0] ss:$12 sps:$4 sm:$0xff]   ;;  %v4179_v50 = vld [vmem:[#allocation2 + $0x1b8] ss:$12 sps:$4 sm:$0xff]  }
 0x1ef   :  { %v4180_v61 = vld [vmem:[#allocation2 + $0x1a0] ss:$12 sps:$4 sm:$0xff]   ;;  %v4181_v62 = vld [vmem:[#allocation2 + $0x188] ss:$12 sps:$4 sm:$0xff]   ;;  %v2466_v6 = vsub.s32 5, %v4490_v44 }
 0x1f0   :  { %2346 = vmatpush1.bf16.msra.mxu1 %v4136_v13 }
 0x1f1   :  { %2307 = vmatpush1.bf16.msra.mxu0 %v4109_v7  ;;  %2347 = vmatprep.subr.bf16.mxu1 %v4140_v16  ;;  %v2463_v7 = vrot.slane %v4546_v35, %v4593_v5 }
 0x1f2   :  { %2308 = vmatprep.subr.bf16.mxu0 %v4113_v8  ;;  %v2467_v8 = vrot.slane %v4546_v35, %v2466_v6 }
 0x1f4   :  { %2348 = vmatpush1.bf16.msra.mxu1 %v4142_v15  ;;  %v2482_v15 = vrot.slane %v2467_v8, %v4593_v5 }
 0x1f5   :  { %2309 = vmatpush1.bf16.msra.mxu0 %v4115_v11  ;;  %2349 = vmatprep.subr.bf16.mxu1 %v4146_v19 }
 0x1f6   :  { %2310 = vmatprep.subr.bf16.mxu0 %v4119_v12  ;;  %v2478_v12 = vrot.slane %v2463_v7, %v4593_v5 }
 0x1f8   :  { %2350 = vmatpush1.bf16.msra.mxu1 %v4148_v21 }
 0x1f9   :  { %2311 = vmatpush2.bf16.msra.mxu0 %v4121_v14  ;;  %3702 = vmatprep.subr.bf16.mxu1 %v4152_v22 }
 0x1fa   :  { %2312 = vmatprep.subr.bf16.mxu0 %v4125_v18 }
 0x1fb   :  { %2368 = vmatmul.mubr.bf16.vlgmr.msra.gmra.mxu1 %v4575_v25 }
 0x1fc   :  { %3703 = vmatpush3.bf16.msra.mxu1 %v4153_v26  ;;  %2408 = vmatprep.mubr.bf16.mxu1 %v4569_v45  ;;  %v4159_v45 = vld [vmem:[#allocation2 + $0xc4] ss:$12 sps:$4 sm:$0xff]  }
 0x1fd   :  { %2313 = vmatpush2.bf16.msra.mxu0 %v4127_v59  ;;  %3704 = vmatprep.subr.bf16.mxu1 %v4157_v27 }
 0x1fe   :  { %2314 = vmatprep.subr.bf16.mxu0 %v4131_v20 }
 0x200   :  { %3705 = vmatpush3.bf16.msra.mxu1 %v4158_v30 }
 0x201   :  { %2315 = vmatpush2.bf16.msra.mxu0 %v4133_v23  ;;  %3706 = vmatprep.subr.bf16.mxu1 %v4162_v31 }
 0x202   :  { %2316 = vmatprep.subr.bf16.mxu0 %v4137_v24 }
 0x204   :  { %3707 = vmatpush3.bf16.msra.mxu1 %v4163_v38 }
 0x205   :  { %2317 = vmatpush2.bf16.msra.mxu0 %v4139_v28  ;;  %3708 = vmatprep.subr.bf16.mxu1 %v4165_v39 }
 0x206   :  { %2318 = vmatprep.subr.bf16.mxu0 %v4143_v29 }
 0x208   :  { %3709 = vmatpush3.bf16.msra.mxu1 %v4166_v32 }
 0x209   :  { %2319 = vmatpush2.bf16.msra.mxu0 %v4145_v36  ;;  %3710 = vmatprep.subr.bf16.mxu1 %v4168_v42  ;;  %v2471_v36 = vrot.slane %v4562_v55, %v4593_v5 }
 0x20a   :  { %2320 = vmatprep.subr.bf16.mxu0 %v4149_v37 }
 0x20c   :  { %3711 = vmatpush3.bf16.msra.mxu1 %v4169_v43 }
 0x20d   :  { %2321 = vmatpush2.bf16.msra.mxu0 %v4151_v40  ;;  %3712 = vmatprep.subr.bf16.mxu1 %v4171_v47  ;;  %v2486_v40 = vrot.slane %v2471_v36, %v4593_v5 }
 0x20e   :  { %2322 = vmatprep.subr.bf16.mxu0 %v4154_v41 }
 0x210   :  { %3713 = vmatpush3.bf16.msra.mxu1 %v4172_v49 }
 0x211   :  { %2323 = vmatpush2.bf16.msra.mxu0 %v4156_v33  ;;  %3714 = vmatprep.subr.bf16.mxu1 %v4174_v51 }
 0x212   :  { %2324 = vmatprep.subr.bf16.mxu0 %v4159_v45 }
 0x214   :  { %3715 = vmatpush3.bf16.msra.mxu1 %v4175_v3 }
 0x215   :  { %2325 = vmatpush2.bf16.msra.mxu0 %v4161_v48  ;;  %3716 = vmatprep.subr.bf16.mxu1 %v4177_v54 }
 0x216   :  { %3764 = vmatprep.subr.bf16.mxu0 %v4430_v53 }
 0x218   :  { %2327 = vmatmul.mubr.bf16.vlgmr.msra.gmra.mxu0 %v1811_v52  ;;  %3717 = vmatpush3.bf16.msra.mxu1 %v4178_v57 }
 0x219   :  { %3765 = vmatpush3.bf16.msra.mxu0 %v4164_v63  ;;  %3780 = vmatprep.mubr.msk.bf16.mxu0 %vm4431_vm0, %v4430_v53 }
 0x21a   :  { %3766 = vmatprep.subr.bf16.mxu0 %v4430_v53 }
 0x21b   :  { %2409 = vmatmul.mubr.bf16.vlgmr.msra.gmra.mxu1 %v1811_v52 }
 0x21d   :  { %3767 = vmatpush3.bf16.msra.mxu0 %v4167_v56 }
 0x21e   :  { %3768 = vmatprep.subr.bf16.mxu0 %v4430_v53 }
 0x221   :  { %3769 = vmatpush3.bf16.msra.mxu0 %v4170_v17 }
 0x222   :  { %3770 = vmatprep.subr.bf16.mxu0 %v4430_v53 }
 0x225   :  { %3771 = vmatpush3.bf16.msra.mxu0 %v4173_v58 }
 0x226   :  { %3772 = vmatprep.subr.bf16.mxu0 %v4430_v53 }
 0x229   :  { %3773 = vmatpush3.bf16.msra.mxu0 %v4176_v60 }
 0x22a   :  { %3774 = vmatprep.subr.bf16.mxu0 %v4430_v53 }
 0x22d   :  { %3775 = vmatpush3.bf16.msra.mxu0 %v4179_v50 }
 0x22e   :  { %3776 = vmatprep.subr.bf16.mxu0 %v4430_v53 }
 0x231   :  { %3777 = vmatpush3.bf16.msra.mxu0 %v4180_v61 }
 0x232   :  { %3778 = vmatprep.subr.bf16.mxu0 %v4430_v53 }
 0x235   :  { %3779 = vmatpush3.bf16.msra.mxu0 %v4181_v62 }
 0x238   :  { %3781 = vmatmul.mubr.bf16.vlgmr.msra.gmra.mxu0 %v4575_v25 }
 0x2bb   :  { %v2369_v0 = vpop.f32.mrf.mxu1 }
 0x2bd   :  { %v2371_v1 = vpop.f32.mrf.mxu1 }
 0x2bf   :  { %v2373_v2 = vpop.f32.mrf.mxu1 }
 0x2c1   :  { %v2374_v4 = vpop.f32.mrf.mxu1 }
 0x2d8   :  { %v2328_v9 = vpop.f32.mrf.mxu0 }
 0x2d9   :  { %v2370_v11 = vadd.f32 %v2369_v0, %v2328_v9 }
 0x2da   :  { %v2330_v13 = vpop.f32.mrf.mxu0 }
 0x2db   :  { %v2457_v16 = vmul.f32 %v2456_v10, %v2370_v11  ;;  %v2372_v14 = vadd.f32 %v2371_v1, %v2330_v13  ;;  %v3718_v23 = vpop.f32.mrf.mxu1 }
 0x2dc   :  { %v2332_v18 = vpop.f32.mrf.mxu0 }
 0x2dd   :  { %v2487_v19 = vadd.f32 %v2478_v12, %v2457_v16  ;;  %v2458_v59 = vmul.f32 %v2456_v10, %v2372_v14  ;;  %v3719_v25 = vpop.f32.mrf.mxu1 }
 0x2de   :  { %v2333_v20 = vpop.f32.mrf.mxu0  ;;  %v3720_v37 = vadd.f32 %v3719_v25, %v3718_v23 }
 0x2df   :  { %v3534_v21 = vmul.f32 -1.442695, %v2487_v19  ;;  %v2488_v22 = vadd.f32 %v2482_v15, %v2458_v59  ;;  %v3721_v26 = vpop.f32.mrf.mxu1 }
 0x2e1   :  { %4182 = vpow2.f32 %v3534_v21  ;;  %v3535_v24 = vmul.f32 -1.442695, %v2488_v22  ;;  %v3722_v27 = vpop.f32.mrf.mxu1 }
 0x2e3   :  { %4184 = vpow2.f32 %v3535_v24 }
 0x2ee   :  { %v4183_v28 = vpop.eup %4182 }
 0x2ef   :  { %v2499_v29 = vadd.f32 1.0, %v4183_v28 }
 0x2f0   :  { %v4185_v30 = vpop.eup %4184 }
 0x2f1   :  { %4186 = vrcp.f32 %v2499_v29  ;;  %v2500_v31 = vadd.f32 1.0, %v4185_v30 }
 0x2f3   :  { %4188 = vrcp.f32 %v2500_v31 }
 0x2f8   :  { %v2450_v38 = vpop.f32.mrf.mxu0 }
 0x2f9   :  { %v2451_v39 = vadd.f32 %v3720_v37, %v2450_v38 }
 0x2fa   :  { %v3782_v41 = vpop.f32.mrf.mxu0 }
 0x2fb   :  { %v2459_v32 = vmul.f32 %v2456_v10, %v2451_v39 }
 0x2fc   :  { %v2453_v42 = vpop.f32.mrf.mxu0 }
 0x2fd   :  { %v2489_v33 = vadd.f32 %v2486_v40, %v2459_v32 }
 0x2fe   :  { %v4187_v43 = vpop.eup %4186  ;;  %v3783_v45 = vpop.f32.mrf.mxu0 }
 0x2ff   :  { %v4605_v47 = vmul.f32 %v4187_v43, %v2487_v19  ;;  %v3536_v48 = vmul.f32 -1.442695, %v2489_v33 }
 0x300   :  { %v4189_v49 = vpop.eup %4188 }
 0x301   :  { %v2509_v51 = vmul.f32 %v4189_v49, %v2488_v22  ;;  %4190 = vpow2.f32 %v3536_v48 }
 0x30e   :  { %v4191_v52 = vpop.eup %4190 }
 0x30f   :  { %v2501_v63 = vadd.f32 1.0, %v4191_v52 }
 0x311   :  { %4192 = vrcp.f32 %v2501_v63 }
 0x31e   :  { %v4193_v3 = vpop.eup %4192 }
 0x31f   :  { %v4607_v54 = vmul.f32 %v4193_v3, %v2489_v33 }
 0x320   :  { %4418 = dma.done.wait [#allocation4 + $0x1], 9216 }
 0x321   :  { %4419 = vsyncadd [#allocation4 + $0x1], 4294958080  ;;  %3069 = vmatprep.mubr.bf16.mxu0 %v4429_v46  ;;  %v4610_v56 = vpack.c.bf16 %v2509_v51, %v2509_v51  ;;  %v4194_v57 = vld [vmem:[#allocation3 + $0xac] ss:$12 sps:$4 sm:$0xff]   ;;  %v4196_v17 = vld [vmem:[#allocation3 + $0xa8] ss:$12 sps:$4 sm:$0xff]   ;;  %v4615_v38 = vpack.c.bf16 %v4607_v54, %v4607_v54 }
 0x322   :  { %2996 = vmatprep.subr.bf16.mxu1 %v4194_v57  ;;  %v4197_v58 = vld [vmem:[#allocation3 + $0x94] ss:$12 sps:$4 sm:$0xff]   ;;  %v4199_v60 = vld [vmem:[#allocation3 + $0x90] ss:$12 sps:$4 sm:$0xff]   ;;  %v4202_v61 = vld [vmem:[#allocation3 + $0x78] ss:$12 sps:$4 sm:$0xff]  }
 0x323   :  { %3028 = vmatprep.mubr.bf16.mxu1 %v4610_v56  ;;  %2997 = vmatpush1.bf16.msra.mxu1 %v4196_v17  ;;  %v4200_v50 = vld [vmem:[#allocation3 + $0x7c] ss:$12 sps:$4 sm:$0xff]   ;;  %v4203_v62 = vld [vmem:[#allocation3 + $0x64] ss:$12 sps:$4 sm:$0xff]   ;;  %v4212_v0 = vld [vmem:[#allocation3 + $0x22c] ss:$12 sps:$4 sm:$0xff]  }
 0x324   :  { %2998 = vmatprep.subr.bf16.mxu1 %v4197_v58  ;;  %v4214_v1 = vld [vmem:[#allocation3 + $0x228] ss:$12 sps:$4 sm:$0xff]   ;;  %v4205_v2 = vld [vmem:[#allocation3 + $0x60] ss:$12 sps:$4 sm:$0xff]   ;;  %3037 = vmatprep.subr.bf16.mxu0 %v4212_v0  ;;  %v4220_v4 = vld [vmem:[#allocation3 + $0x210] ss:$12 sps:$4 sm:$0xff]  }
 0x325   :  { %3038 = vmatpush1.bf16.msra.mxu0 %v4214_v1  ;;  %v4218_v46 = vld [vmem:[#allocation3 + $0x214] ss:$12 sps:$4 sm:$0xff]   ;;  %v4206_v6 = vld [vmem:[#allocation3 + $0x4c] ss:$12 sps:$4 sm:$0xff]   ;;  %v4224_v8 = vld [vmem:[#allocation3 + $0x1fc] ss:$12 sps:$4 sm:$0xff]  }
 0x326   :  { %3039 = vmatprep.subr.bf16.mxu0 %v4218_v46  ;;  %v4208_v7 = vld [vmem:[#allocation3 + $0x48] ss:$12 sps:$4 sm:$0xff]   ;;  %v4226_v10 = vld [vmem:[#allocation3 + $0x1f8] ss:$12 sps:$4 sm:$0xff]   ;;  %v4211_v12 = vld [vmem:[#allocation3 + $0x30] ss:$12 sps:$4 sm:$0xff]  }
 0x327   :  { %2999 = vmatpush1.bf16.msra.mxu1 %v4199_v60  ;;  %v4209_v9 = vld [vmem:[#allocation3 + $0x34] ss:$12 sps:$4 sm:$0xff]   ;;  %v4230_v11 = vld [vmem:[#allocation3 + $0x1e4] ss:$12 sps:$4 sm:$0xff]   ;;  %v4215_v13 = vld [vmem:[#allocation3 + $0x1c] ss:$12 sps:$4 sm:$0xff]  }
 0x328   :  { %3000 = vmatprep.subr.bf16.mxu1 %v4200_v50  ;;  %v4232_v16 = vld [vmem:[#allocation3 + $0x1e0] ss:$12 sps:$4 sm:$0xff]   ;;  %v4217_v15 = vld [vmem:[#allocation3 + $0x18] ss:$12 sps:$4 sm:$0xff]   ;;  %v4238_v19 = vld [vmem:[#allocation3 + $0x1c8] ss:$12 sps:$4 sm:$0xff]  }
 0x329   :  { %3040 = vmatpush1.bf16.msra.mxu0 %v4220_v4  ;;  %v4236_v14 = vld [vmem:[#allocation3 + $0x1cc] ss:$12 sps:$4 sm:$0xff]   ;;  %v4221_v18 = vld [vmem:[#allocation3 + $0x4] ss:$12 sps:$4 sm:$0xff]   ;;  %v4242_v59 = vld [vmem:[#allocation3 + $0x1b4] ss:$12 sps:$4 sm:$0xff]  }
 0x32a   :  { %3041 = vmatprep.subr.bf16.mxu0 %v4224_v8  ;;  %v4223_v20 = vld [vmem:[#allocation3] ss:$12 sps:$4 sm:$0xff]   ;;  %v4244_v22 = vld [vmem:[#allocation3 + $0x1b0] ss:$12 sps:$4 sm:$0xff]   ;;  %v4229_v24 = vld [vmem:[#allocation3 + $0x168] ss:$12 sps:$4 sm:$0xff]  }
 0x32b   :  { %3001 = vmatpush1.bf16.msra.mxu1 %v4202_v61  ;;  %v4227_v21 = vld [vmem:[#allocation3 + $0x16c] ss:$12 sps:$4 sm:$0xff]   ;;  %v4248_v23 = vld [vmem:[#allocation3 + $0x19c] ss:$12 sps:$4 sm:$0xff]   ;;  %v4233_v26 = vld [vmem:[#allocation3 + $0x154] ss:$12 sps:$4 sm:$0xff]   ;;  %v2513_v61 = vpack.c.bf16 %v4605_v47, %v4605_v47 }
 0x32c   :  { %3002 = vmatprep.subr.bf16.mxu1 %v4203_v62  ;;  %v4250_v25 = vld [vmem:[#allocation3 + $0x198] ss:$12 sps:$4 sm:$0xff]   ;;  %v4235_v28 = vld [vmem:[#allocation3 + $0x150] ss:$12 sps:$4 sm:$0xff]   ;;  %v4256_v30 = vld [vmem:[#allocation3 + $0x180] ss:$12 sps:$4 sm:$0xff]  }
 0x32d   :  { %3042 = vmatpush1.bf16.msra.mxu0 %v4226_v10  ;;  %v4254_v27 = vld [vmem:[#allocation3 + $0x184] ss:$12 sps:$4 sm:$0xff]   ;;  %v4239_v29 = vld [vmem:[#allocation3 + $0x13c] ss:$12 sps:$4 sm:$0xff]   ;;  %v4247_v41 = vld [vmem:[#allocation3 + $0x120] ss:$12 sps:$4 sm:$0xff]  }
 0x32e   :  { %3043 = vmatprep.subr.bf16.mxu0 %v4230_v11  ;;  %v4260_v31 = vld [vmem:[#allocation3 + $0x170] ss:$12 sps:$4 sm:$0xff]   ;;  %v4241_v36 = vld [vmem:[#allocation3 + $0x138] ss:$12 sps:$4 sm:$0xff]   ;;  %v4270_v33 = vld [vmem:[#allocation3 + $0x140] ss:$12 sps:$4 sm:$0xff]  }
 0x32f   :  { %3003 = vmatpush1.bf16.msra.mxu1 %v4205_v2  ;;  %v4245_v37 = vld [vmem:[#allocation3 + $0x124] ss:$12 sps:$4 sm:$0xff]   ;;  %v4251_v32 = vld [vmem:[#allocation3 + $0x10c] ss:$12 sps:$4 sm:$0xff]   ;;  %v4253_v43 = vld [vmem:[#allocation3 + $0x108] ss:$12 sps:$4 sm:$0xff]  }
 0x330   :  { %3004 = vmatprep.subr.bf16.mxu1 %v4206_v6  ;;  %v4261_v39 = vld [vmem:[#allocation3 + $0xb0] ss:$12 sps:$4 sm:$0xff]   ;;  %v4265_v40 = vld [vmem:[#allocation3 + $0x158] ss:$12 sps:$4 sm:$0xff]   ;;  %v4257_v45 = vld [vmem:[#allocation3 + $0xf4] ss:$12 sps:$4 sm:$0xff]  }
 0x331   :  { %3044 = vmatpush1.bf16.msra.mxu0 %v4232_v16  ;;  %v4266_v42 = vld [vmem:[#allocation3 + $0x98] ss:$12 sps:$4 sm:$0xff]   ;;  %v4271_v48 = vld [vmem:[#allocation3 + $0x80] ss:$12 sps:$4 sm:$0xff]   ;;  %v4273_v49 = vld [vmem:[#allocation3 + $0x128] ss:$12 sps:$4 sm:$0xff]  }
 0x332   :  { %3045 = vmatprep.subr.bf16.mxu0 %v4236_v14  ;;  %v4259_v51 = vld [vmem:[#allocation3 + $0xf0] ss:$12 sps:$4 sm:$0xff]   ;;  %v4274_v63 = vld [vmem:[#allocation3 + $0x68] ss:$12 sps:$4 sm:$0xff]   ;;  %v4264_v54 = vld [vmem:[#allocation3 + $0xd8] ss:$12 sps:$4 sm:$0xff]  }
 0x333   :  { %3005 = vmatpush1.bf16.msra.mxu1 %v4208_v7  ;;  %v4262_v52 = vld [vmem:[#allocation3 + $0xdc] ss:$12 sps:$4 sm:$0xff]   ;;  %v4279_v17 = vld [vmem:[#allocation3 + $0xf8] ss:$12 sps:$4 sm:$0xff]   ;;  %v4269_v58 = vld [vmem:[#allocation3 + $0xc0] ss:$12 sps:$4 sm:$0xff]  }
 0x334   :  { %3006 = vmatprep.subr.bf16.mxu1 %v4209_v9  ;;  %v4276_v3 = vld [vmem:[#allocation3 + $0x110] ss:$12 sps:$4 sm:$0xff]   ;;  %v4280_v60 = vld [vmem:[#allocation3 + $0x38] ss:$12 sps:$4 sm:$0xff]   ;;  %v4282_v50 = vld [vmem:[#allocation3 + $0xe0] ss:$12 sps:$4 sm:$0xff]  }
 0x335   :  { %3046 = vmatpush1.bf16.msra.mxu0 %v4238_v19  ;;  %v4277_v57 = vld [vmem:[#allocation3 + $0x50] ss:$12 sps:$4 sm:$0xff]   ;;  %v4283_v0 = vld [vmem:[#allocation3 + $0x20] ss:$12 sps:$4 sm:$0xff]   ;;  %v4285_v1 = vld [vmem:[#allocation3 + $0xc8] ss:$12 sps:$4 sm:$0xff]  }
 0x336   :  { %3047 = vmatprep.subr.bf16.mxu0 %v4242_v59  ;;  %v4272_v62 = vld [vmem:[#allocation3 + $0x230] ss:$12 sps:$4 sm:$0xff]   ;;  %v4275_v2 = vld [vmem:[#allocation3 + $0x218] ss:$12 sps:$4 sm:$0xff]   ;;  %v4286_v46 = vld [vmem:[#allocation3 + $0x8] ss:$12 sps:$4 sm:$0xff]  }
 0x337   :  { %3007 = vmatpush1.bf16.msra.mxu1 %v4211_v12  ;;  %v4278_v47 = vld [vmem:[#allocation3 + $0x200] ss:$12 sps:$4 sm:$0xff]   ;;  %v4281_v4 = vld [vmem:[#allocation3 + $0x1e8] ss:$12 sps:$4 sm:$0xff]   ;;  %v4284_v6 = vld [vmem:[#allocation3 + $0x1d0] ss:$12 sps:$4 sm:$0xff]  }
 0x338   :  { %3008 = vmatprep.subr.bf16.mxu1 %v4215_v13  ;;  %v4287_v7 = vld [vmem:[#allocation3 + $0x1b8] ss:$12 sps:$4 sm:$0xff]   ;;  %v4288_v8 = vld [vmem:[#allocation3 + $0x1a0] ss:$12 sps:$4 sm:$0xff]   ;;  %v4289_v9 = vld [vmem:[#allocation3 + $0x188] ss:$12 sps:$4 sm:$0xff]  }
 0x339   :  { %3048 = vmatpush1.bf16.msra.mxu0 %v4244_v22  ;;  %v3168_v19 = vsub.s32 6, %v4490_v44  ;;  %vm3233_vm1 = vcmask 1041408   ;;  %vm3243_vm2 = vcmask 1024  }
 0x33a   :  { %3049 = vmatprep.subr.bf16.mxu0 %v4248_v23 }
 0x33b   :  { %3009 = vmatpush1.bf16.msra.mxu1 %v4217_v15 }
 0x33c   :  { %3010 = vmatprep.subr.bf16.mxu1 %v4221_v18 }
 0x33d   :  { %3050 = vmatpush1.bf16.msra.mxu0 %v4250_v25 }
 0x33e   :  { %3051 = vmatprep.subr.bf16.mxu0 %v4254_v27 }
 0x33f   :  { %3011 = vmatpush1.bf16.msra.mxu1 %v4223_v20  ;;  %v3164_v20 = vsub.s32 2, %v4490_v44 }
 0x340   :  { %3012 = vmatprep.subr.bf16.mxu1 %v4227_v21 }
 0x341   :  { %3052 = vmatpush1.bf16.msra.mxu0 %v4256_v30  ;;  %v3165_v25 = vrot.slane %v4546_v35, %v3164_v20  ;;  %v3173_v44 = vrot.slane %v4562_v55, %v3164_v20 }
 0x342   :  { %3733 = vmatprep.subr.bf16.mxu0 %v4260_v31 }
 0x343   :  { %3013 = vmatpush2.bf16.msra.mxu1 %v4229_v24  ;;  %v3180_v31 = vrot.slane %v3165_v25, %v3164_v20 }
 0x344   :  { %3014 = vmatprep.subr.bf16.mxu1 %v4233_v26  ;;  %3070 = vmatmul.mubr.bf16.vlgmr.msra.gmra.mxu0 %v4615_v38  ;;  %v3158_v26 = vstv %s4486_s1 }
 0x345   :  { %3734 = vmatpush3.bf16.msra.mxu0 %v4261_v39  ;;  %3110 = vmatprep.mubr.bf16.mxu0 %v4610_v56  ;;  %v4267_v56 = vld [vmem:[#allocation3 + $0xc4] ss:$12 sps:$4 sm:$0xff]  }
 0x346   :  { %3735 = vmatprep.subr.bf16.mxu0 %v4265_v40 }
 0x347   :  { %3015 = vmatpush2.bf16.msra.mxu1 %v4235_v28 }
 0x348   :  { %3016 = vmatprep.subr.bf16.mxu1 %v4239_v29 }
 0x349   :  { %3736 = vmatpush3.bf16.msra.mxu0 %v4266_v42  ;;  %v3188_v42 = vrot.slane %v3173_v44, %v3164_v20 }
 0x34a   :  { %3737 = vmatprep.subr.bf16.mxu0 %v4270_v33 }
 0x34b   :  { %3017 = vmatpush2.bf16.msra.mxu1 %v4241_v36 }
 0x34c   :  { %3018 = vmatprep.subr.bf16.mxu1 %v4245_v37 }
 0x34d   :  { %3738 = vmatpush3.bf16.msra.mxu0 %v4271_v48 }
 0x34e   :  { %3739 = vmatprep.subr.bf16.mxu0 %v4273_v49 }
 0x34f   :  { %3019 = vmatpush2.bf16.msra.mxu1 %v4247_v41 }
 0x350   :  { %3020 = vmatprep.subr.bf16.mxu1 %v4251_v32 }
 0x351   :  { %3740 = vmatpush3.bf16.msra.mxu0 %v4274_v63 }
 0x352   :  { %3741 = vmatprep.subr.bf16.mxu0 %v4276_v3 }
 0x353   :  { %3021 = vmatpush2.bf16.msra.mxu1 %v4253_v43 }
 0x354   :  { %3022 = vmatprep.subr.bf16.mxu1 %v4257_v45 }
 0x355   :  { %3742 = vmatpush3.bf16.msra.mxu0 %v4277_v57 }
 0x356   :  { %3743 = vmatprep.subr.bf16.mxu0 %v4279_v17  ;;  %v3213_v17 = vld [vmem:[%s4653_s6] sm:$0x7] }
 0x357   :  { %3023 = vmatpush2.bf16.msra.mxu1 %v4259_v51 }
 0x358   :  { %3024 = vmatprep.subr.bf16.mxu1 %v4262_v52 }
 0x359   :  { %3744 = vmatpush3.bf16.msra.mxu0 %v4280_v60  ;;  %v3222_v60 = vrot.slane %v3213_v17, %v4593_v5 }
 0x35a   :  { %3745 = vmatprep.subr.bf16.mxu0 %v4282_v50 }
 0x35b   :  { %3025 = vmatpush2.bf16.msra.mxu1 %v4264_v54 }
 0x35c   :  { %3026 = vmatprep.subr.bf16.mxu1 %v4267_v56 }
 0x35d   :  { %3746 = vmatpush3.bf16.msra.mxu0 %v4283_v0  ;;  %v3226_v0 = vrot.slane %v3213_v17, %v3164_v20 }
 0x35e   :  { %3747 = vmatprep.subr.bf16.mxu0 %v4285_v1 }
 0x35f   :  { %3027 = vmatpush2.bf16.msra.mxu1 %v4269_v58 }
 0x360   :  { %3784 = vmatprep.subr.bf16.mxu1 %v4430_v53 }
 0x361   :  { %3748 = vmatpush3.bf16.msra.mxu0 %v4286_v46 }
 0x362   :  { %3029 = vmatmul.mubr.bf16.vlgmr.msra.gmra.mxu1 %v2513_v61 }
 0x363   :  { %3785 = vmatpush3.bf16.msra.mxu1 %v4272_v62  ;;  %3800 = vmatprep.mubr.msk.bf16.mxu1 %vm4431_vm0, %v4430_v53 }
 0x364   :  { %3786 = vmatprep.subr.bf16.mxu1 %v4430_v53  ;;  %3111 = vmatmul.mubr.bf16.vlgmr.msra.gmra.mxu0 %v2513_v61  ;;  %v3218_v61 = vrot.slane %v3213_v17, %v4544_v34 }
 0x367   :  { %3787 = vmatpush3.bf16.msra.mxu1 %v4275_v2 }
 0x368   :  { %3788 = vmatprep.subr.bf16.mxu1 %v4430_v53 }
 0x36b   :  { %3789 = vmatpush3.bf16.msra.mxu1 %v4278_v47 }
 0x36c   :  { %3790 = vmatprep.subr.bf16.mxu1 %v4430_v53 }
 0x36f   :  { %3791 = vmatpush3.bf16.msra.mxu1 %v4281_v4 }
 0x370   :  { %3792 = vmatprep.subr.bf16.mxu1 %v4430_v53 }
 0x373   :  { %3793 = vmatpush3.bf16.msra.mxu1 %v4284_v6 }
 0x374   :  { %3794 = vmatprep.subr.bf16.mxu1 %v4430_v53 }
 0x377   :  { %3795 = vmatpush3.bf16.msra.mxu1 %v4287_v7 }
 0x378   :  { %3796 = vmatprep.subr.bf16.mxu1 %v4430_v53 }
 0x37b   :  { %3797 = vmatpush3.bf16.msra.mxu1 %v4288_v8 }
 0x37c   :  { %3798 = vmatprep.subr.bf16.mxu1 %v4430_v53  ;;  %v3169_v53 = vrot.slane %v4546_v35, %v3168_v19 }
 0x37e   :  { %v3184_v29 = vrot.slane %v3169_v53, %v3164_v20 }
 0x37f   :  { %3799 = vmatpush3.bf16.msra.mxu1 %v4289_v9 }
 0x382   :  { %3801 = vmatmul.mubr.bf16.vlgmr.msra.gmra.mxu1 %v4615_v38 }
 0x404   :  { %v3071_v10 = vpop.f32.mrf.mxu0 }
 0x406   :  { %v3073_v11 = vpop.f32.mrf.mxu0 }
 0x408   :  { %v3075_v12 = vpop.f32.mrf.mxu0 }
 0x40a   :  { %v3076_v13 = vpop.f32.mrf.mxu0 }
 0x422   :  { %v3030_v16 = vpop.f32.mrf.mxu1 }
 0x423   :  { %v3072_v24 = vadd.f32 %v3071_v10, %v3030_v16  ;;  %v3241_v10 = vstv %s4488_s20 }
 0x424   :  { %v3032_v14 = vpop.f32.mrf.mxu1  ;;  %v3749_v59 = vpop.f32.mrf.mxu0 }
 0x425   :  { %v3074_v22 = vadd.f32 %v3073_v11, %v3032_v14  ;;  %v3159_v30 = vmul.f32 %v3158_v26, %v3072_v24 }
 0x426   :  { %v3034_v15 = vpop.f32.mrf.mxu1  ;;  %v3750_v21 = vpop.f32.mrf.mxu0 }
 0x427   :  { %v3160_v28 = vmul.f32 %v3158_v26, %v3074_v22  ;;  %v3189_v37 = vadd.f32 %v3180_v31, %v3159_v30  ;;  %v3751_v40 = vadd.f32 %v3750_v21, %v3749_v59 }
 0x428   :  { %v3035_v18 = vpop.f32.mrf.mxu1  ;;  %v3752_v23 = vpop.f32.mrf.mxu0 }
 0x429   :  { %v3190_v36 = vadd.f32 %v3184_v29, %v3160_v28  ;;  %v3609_v39 = vmul.f32 -1.442695, %v3189_v37 }
 0x42a   :  { %v3753_v27 = vpop.f32.mrf.mxu0 }
 0x42b   :  { %v3610_v38 = vmul.f32 -1.442695, %v3190_v36 }
 0x42d   :  { %4290 = vpow2.f32 %v3610_v38 }
 0x42e   :  { %4292 = vpow2.f32 %v3609_v39 }
 0x43a   :  { %v4291_v51 = vpop.eup %4290 }
 0x43b   :  { %v4293_v52 = vpop.eup %4292  ;;  %v3202_v63 = vadd.f32 1.0, %v4291_v51 }
 0x43c   :  { %v3201_v3 = vadd.f32 1.0, %v4293_v52 }
 0x442   :  { %v3152_v41 = vpop.f32.mrf.mxu1 }
 0x443   :  { %v3153_v32 = vadd.f32 %v3751_v40, %v3152_v41 }
 0x444   :  { %v3802_v33 = vpop.f32.mrf.mxu1 }
 0x445   :  { %v3161_v35 = vmul.f32 %v3158_v26, %v3153_v32 }
 0x446   :  { %v3155_v43 = vpop.f32.mrf.mxu1 }
 0x447   :  { %v3191_v45 = vadd.f32 %v3188_v42, %v3161_v35 }
 0x448   :  { %v3803_v48 = vpop.f32.mrf.mxu1 }
 0x449   :  { %v3611_v49 = vmul.f32 -1.442695, %v3191_v45 }
 0x44b   :  { %4294 = vpow2.f32 %v3611_v49 }
 0x44c   :  { %4296 = vrcp.f32 %v3202_v63 }
 0x44d   :  { %4298 = vrcp.f32 %v3201_v3 }
 0x458   :  { %v4295_v54 = vpop.eup %4294 }
 0x459   :  { %v3203_v57 = vadd.f32 1.0, %v4295_v54  ;;  %v4297_v55 = vpop.eup %4296 }
 0x45a   :  { %v4299_v56 = vpop.eup %4298  ;;  %v3211_v58 = vmul.f32 %v4297_v55, %v3190_v36 }
 0x45b   :  { %4300 = vrcp.f32 %v3203_v57  ;;  %v3210_v50 = vmul.f32 %v4299_v56, %v3189_v37 }
 0x45c   :  { %v3231_v62 = vmul.f32 %v3222_v60, %v3211_v58 }
 0x45d   :  { %v3230_v1 = vmul.f32 %v3218_v61, %v3210_v50 }
 0x45e   :  { %v3235_v47 = vsel %vm3233_vm1, %v3231_v62, 0.0 }
 0x45f   :  { %v3234_v6 = vsel %vm3233_vm1, %v3230_v1, 0.0 }
 0x460   :  { %v3236_v7 = vadd.f32 %v3235_v47, %v3234_v6 }
 0x468   :  { %v4301_v2 = vpop.eup %4300 }
 0x469   :  { %v3212_v46 = vmul.f32 %v4301_v2, %v3191_v45 }
 0x46b   :  { %v3232_v4 = vmul.f32 %v3226_v0, %v3212_v46 }
 0x46d   :  { %v3237_v8 = vsel %vm3233_vm1, %v3232_v4, 0.0 }
 0x46e   :  { %v3238_v9 = vadd.f32 %v3237_v8, %v3236_v7 }
 0x470   :  { %3239 = vadd.xlane.f32.xlu0 %v3238_v9 }
 0x4f9   :  { %v3240_v11 = vpop.xlane.xlu0 %3239 }
 0x4fa   :  { %v3242_v5 = vadd.f32 %v3241_v10, %v3240_v11 }
 0x4fc   :  { %3244 = vst.msk [vmem:[%s4654_s7] sm:$0x3] %vm3243_vm2, %v3242_v5 }
 0x4fd   :  { %3249 = vsyncpa [#allocation6], 1 }
 0x4fe   :  { %3250 = vsyncpa [#allocation10], 1 }
 0x4ff   :  { %3251 = vsyncpa [#allocation7], 1 }
 0x500   :  { %3252 = vsyncmov [#allocation4] }
 0x503   :  { %s3253_s8 = vpop.sfrf %3252 }
 0x504   :  { %p3612_p11 = scmp.ne.s32.totalorder %s3253_s8, 0 }
 0x506   :  { %3257 = shalt.err (%p3612_p11)  }
 0x507   :  { %3259 = vsyncmov [#allocation4 + $0x1] }
 0x50a   :  { %s3260_s9 = vpop.sfrf %3259 }
 0x50b   :  { %p3613_p12 = scmp.ne.s32.totalorder %s3260_s9, 0 }
 0x50d   :  { %3264 = shalt.err (%p3613_p12)  }

</bundles_post_ra>
